<compile_context>
chip_gen: v7x
topology: tpu7x:2x2x1
jax: 0.10.0
libtpu: 0.0.40
codegen_flags: <defaults>
</compile_context>

<pallas_src>
import functools

import jax
import jax.numpy as jnp
from jax import lax
from jax.experimental import pallas as pl
from jax.experimental.pallas import tpu as pltpu


# ------------------------------ static geometry -------------------------------

def _round16(v):
    return ((v + 15) // 16) * 16


def _plan_rows(h, w, num_layers, ksize):
    """Layer-0 grid, per-layer valid spatial dims, and the number of full-width-grid
    rows each layer computes (R_l, padded to 16 so bf16/f32 reshapes are free)."""
    oh0 = (h - ksize) // 2 + 1
    ow0 = (w - ksize) // 2 + 1
    ohs, ows = [oh0], [ow0]
    for _ in range(1, num_layers):
        ohs.append(ohs[-1] - (ksize - 1))
        ows.append(ows[-1] - (ksize - 1))
    assert ohs[-1] >= 1 and ows[-1] >= 1, "input too small for this many conv layers"
    max_shift = (ksize - 1) * ow0 + (ksize - 1)          # largest (kh, kw) row shift
    rows = [0] * num_layers
    rows[-1] = _round16((ohs[-1] - 1) * ow0 + ows[-1])
    for l in range(num_layers - 2, -1, -1):
        rows[l] = max(_round16((ohs[l] - 1) * ow0 + ows[l]),
                      _round16(rows[l + 1] + max_shift))   # next layer reads [s, s+R_{l+1})
    return oh0, ow0, ohs, ows, rows


# ----------------------------- fused Pallas kernel ----------------------------

def _shared_cnn_kernel(*refs, layer_rows, grid_width, out_hw, ksize):
    """One grid step == B images.  refs layout:
       p0_ref                 (B, R0, ksize*ksize*Cin)   layer-0 patches (wrapper-built)
       w_refs[l]              (K_l, F)                   im2col weights (bf16 or f32)
       b_refs[l]              (1, F)                     bias (f32)
       o_ref                  (B, OH*OW, F)              final conv output (f32)
       act_refs[l] (scratch)  (B, R_l, F)                activations of layers 0..L-2
    """
    L = len(layer_rows)
    p0_ref = refs[0]
    w_refs = refs[1:1 + L]
    b_refs = refs[1 + L:1 + 2 * L]
    o_ref = refs[1 + 2 * L]
    act_refs = refs[2 + 2 * L:]

    B = p0_ref.shape[0]
    F = w_refs[0].shape[1]
    oh_out, ow_out = out_hw

    def epilogue(acc, l, rows):
        acc = acc + b_refs[l][...]                         # (B*rows, F) f32
        if l < L - 1:
            acc = jnp.maximum(acc, 0.0)                    # fused ReLU feeding next conv
            # one dense store per layer (rows % 16 == 0 -> aligned, unmasked writes)
            act_refs[l][...] = acc.reshape(B, rows, F).astype(act_refs[l].dtype)
        else:
            acc = acc.reshape(B, rows, F)                  # final conv: no ReLU
            for r in range(oh_out):                        # gather valid rows of the grid
                o_ref[:, pl.ds(r * ow_out, ow_out), :] = (
                    acc[:, r * grid_width:r * grid_width + ow_out, :].astype(o_ref.dtype))

    # ---- layer 0 (stride 2): patches come pre-built from the wrapper; one matmul ----
    r0 = layer_rows[0]
    k0 = p0_ref.shape[2]
    acc = jnp.dot(p0_ref[...].reshape(B * r0, k0), w_refs[0][...],
                  preferred_element_type=jnp.float32)
    epilogue(acc, 0, r0)

    # ---- stride-1 layers: im2col slab assembled in registers from 9 row-shifted ----
    # ---- loads of the previous activation; zero scatter stores, one matmul/layer ----
    for l in range(1, L):
        rl = layer_rows[l]
        src = act_refs[l - 1]
        slab = jnp.concatenate(
            [src[:, pl.ds(kh * grid_width + kw, rl), :]
             for kh in range(ksize) for kw in range(ksize)],
            axis=-1)                                        # (B, rl, ksize*ksize*F)
        acc = jnp.dot(slab.reshape(B * rl, ksize * ksize * F), w_refs[l][...],
                      preferred_element_type=jnp.float32)
        epilogue(acc, l, rl)


# ------------------------------ forward wrapper -------------------------------

def shared_cnn_forward(x_nchw, kernel_params, *, ksize=3, max_block_batch=32):
    """SharedCNN.forward.  Input/output are NCHW to match the PyTorch module."""
    N, C, H, W = x_nchw.shape
    L = len(kernel_params)
    F = kernel_params[0][0].shape[1]
    wdtype = kernel_params[0][0].dtype
    oh0, ow0, ohs, ows, rows = _plan_rows(H, W, L, ksize)
    oh_out, ow_out = ohs[-1], ows[-1]
    m_out = oh_out * ow_out
    m0 = oh0 * ow0
    k0 = ksize * ksize * C

    # Layer-0 im2col in the wrapper (stride-2 gather, lane order (kh, kw, c) matching the
    # weight layout).  Rows zero-padded to R0 so the kernel never reads uninitialized VMEM.
    x = jnp.transpose(x_nchw, (0, 2, 3, 1)).astype(jnp.float32)          # (N, H, W, C)
    pieces = [x[:, kh:kh + 2 * (oh0 - 1) + 1:2, kw:kw + 2 * (ow0 - 1) + 1:2, :]
              for kh in range(ksize) for kw in range(ksize)]
    p0 = jnp.concatenate(pieces, axis=-1).reshape(N, m0, k0)
    p0 = jnp.pad(p0, ((0, 0), (0, rows[0] - m0), (0, 0))).astype(wdtype)

    # Block the batch: B images per grid step (largest divisor of N <= max_block_batch).
    B = 1
    for d in range(min(N, max_block_batch), 0, -1):
        if N % d == 0:
            B = d
            break
    grid = (N // B,)

    in_specs = [pl.BlockSpec((B, rows[0], k0), lambda i: (i, 0, 0))]
    in_specs += [pl.BlockSpec(w.shape, lambda i: (0, 0)) for w, _ in kernel_params]
    in_specs += [pl.BlockSpec(b.shape, lambda i: (0, 0)) for _, b in kernel_params]
    out_spec = pl.BlockSpec((B, m_out, F), lambda i: (i, 0, 0))
    scratch_shapes = [pltpu.VMEM((B, rows[l], F), wdtype) for l in range(L - 1)]

    flops = 2 * N * sum(r * (ksize * ksize * (C if l == 0 else F)) * F
                        for l, r in enumerate(rows))
    bytes_accessed = (int(p0.size) * p0.dtype.itemsize + N * m_out * F * 4
                      + sum(int(w.size) * w.dtype.itemsize + int(b.size) * 4
                            for w, b in kernel_params))

    out = pl.pallas_call(
        functools.partial(_shared_cnn_kernel, layer_rows=tuple(rows),
                          grid_width=ow0, out_hw=(oh_out, ow_out), ksize=ksize),
        grid=grid,
        out_shape=jax.ShapeDtypeStruct((N, m_out, F), jnp.float32),
        in_specs=in_specs,
        out_specs=out_spec,
        scratch_shapes=scratch_shapes,
        compiler_params=pltpu.CompilerParams(
            dimension_semantics=("parallel",),             # batch grid -> megacore / 2 TCs
            vmem_limit_bytes=32 * 1024 * 1024),            # ~2-3 MB/step actually used
        cost_estimate=pl.CostEstimate(flops=flops, transcendentals=0,
                                      bytes_accessed=bytes_accessed),
    )(p0, *[w for w, _ in kernel_params], *[b for _, b in kernel_params])

    return jnp.transpose(out.reshape(N, oh_out, ow_out, F), (0, 3, 1, 2))


# --------------------------- parameter creation / prep ------------------------

def _orthogonal(key, rows, cols, gain):
    """Orthogonal init matching nn.init.orthogonal_ (rows orthonormal when rows<=cols)."""
    n = max(rows, cols)
    a = jax.random.normal(key, (n, n), dtype=jnp.float32)
    q, r = jnp.linalg.qr(a)
    d = jnp.diagonal(r)
    q = q * jnp.where(d == 0, 1.0, jnp.sign(d))[None, :]
    return gain * q[:rows, :cols]


def make_shared_cnn_params(key, obs_channels, num_layers, num_filters, ksize=3):
    """PyTorch-layout params: list of (w [Cout, Cin, KH, KW] f32, b [Cout] f32)."""
    gain = float(jnp.sqrt(2.0))                 # nn.init.calculate_gain('relu')
    params = []
    cin = obs_channels
    for _ in range(num_layers):
        key, sub = jax.random.split(key)
        w = _orthogonal(sub, num_filters, cin * ksize * ksize, gain).reshape(
            num_filters, cin, ksize, ksize)
        b = jnp.zeros((num_filters,), jnp.float32)   # orthogonal_init zeroes conv bias
        params.append((w, b))
        cin = num_filters
    return params


def prepare_kernel_params(torch_params, ksize=3, mxu_dtype=jnp.bfloat16):
    """OIHW -> (kh, kw, cin) x Cout matmul layout; fold NormalizeImg's 1/255 into the
    layer-0 weights; cast to the MXU input dtype (bf16 on all TPU generations)."""
    kparams = []
    for idx, (w, b) in enumerate(torch_params):
        cout, cin, kh, kw = w.shape
        w_mat = jnp.transpose(w, (2, 3, 1, 0)).reshape(kh * kw * cin, cout)
        if idx == 0:
            w_mat = w_mat * (1.0 / 255.0)            # fold NormalizeImg (x/255)
        kparams.append((w_mat.astype(mxu_dtype),
                        b.reshape(1, cout).astype(jnp.float32)))
    return kparams


# ------------------------------ plain-XLA reference ----------------------------

def _reference_forward(x_nchw, torch_params, ksize=3):
    """Mirrors the PyTorch module exactly: x/255 -> conv(s=2) -> [relu -> conv]*."""
    x = x_nchw.astype(jnp.float32) / 255.0           # NormalizeImg(mean_zero=False)
    for idx, (w, b) in enumerate(torch_params):
        if idx > 0:
            x = jnp.maximum(x, 0.0)                  # nn.ReLU between convs
        stride = 2 if idx == 0 else 1
        x = lax.conv_general_dilated(
            x, w, window_strides=(stride, stride), padding="VALID",
            dimension_numbers=("NCHW", "OIHW", "NCHW"))
        x = x + b[None, :, None, None]
    return x


# ----------------------------------- main ---------------------------------------

if __name__ == "__main__":
    # SharedCNN(obs_shape=(4, 16, 16), num_layers=3, num_filters=32)
    # (16x16 input only admits 3 conv layers before the spatial dim drops below 3.)
    batch, channels, spatial = 2, 4, 16
    num_layers, num_filters = 3, 32

    key = jax.random.PRNGKey(0)
    key_x, key_p = jax.random.split(key)
    x = jax.random.uniform(key_x, (batch, channels, spatial, spatial),
                           minval=0.0, maxval=255.0, dtype=jnp.float32)
    torch_params = make_shared_cnn_params(key_p, channels, num_layers, num_filters)

    fwd = jax.jit(shared_cnn_forward)
    ref = jax.block_until_ready(_reference_forward(x, torch_params))
    scale = float(jnp.max(jnp.abs(ref)))

    # 1) f32 weights/activations: validates index math, weight layout and ReLU placement
    #    (tolerance relative to output scale absorbs the TPU's default f32-matmul mode).
    kparams_f32 = prepare_kernel_params(torch_params, mxu_dtype=jnp.float32)
    out32 = jax.block_until_ready(fwd(x, kparams_f32))
    assert out32.shape == (batch, num_filters, 3, 3), out32.shape
    err32 = float(jnp.max(jnp.abs(out32 - ref)))
    assert err32 <= 5e-2 * (1.0 + scale), (err32, scale)

    # 2) bf16 fast path (default; used on v5e/v6e/v7x alike — the MXU takes bf16 natively,
    #    accumulation stays f32).
    kparams_bf16 = prepare_kernel_params(torch_params, mxu_dtype=jnp.bfloat16)
    outbf = jax.block_until_ready(fwd(x, kparams_bf16))
    errbf = float(jnp.max(jnp.abs(outbf - ref)))
    assert errbf <= 5e-2 * (1.0 + scale), (errbf, scale)

    print("KERNEL_OK")
</pallas_src>

<mosaic_0001>
module attributes {stable_mosaic.version = 11 : i64} {
  func.func @_shared_cnn_kernel(%arg0: i32, %arg1: memref<2x64x36xf32, #tpu.memory_space<vmem>>, %arg2: memref<36x32xf32, #tpu.memory_space<vmem>>, %arg3: memref<288x32xf32, #tpu.memory_space<vmem>>, %arg4: memref<288x32xf32, #tpu.memory_space<vmem>>, %arg5: memref<1x32xf32, #tpu.memory_space<vmem>>, %arg6: memref<1x32xf32, #tpu.memory_space<vmem>>, %arg7: memref<1x32xf32, #tpu.memory_space<vmem>>, %arg8: memref<2x9x32xf32, #tpu.memory_space<vmem>>, %arg9: memref<2x64x32xf32, #tpu.memory_space<vmem>>, %arg10: memref<2x48x32xf32, #tpu.memory_space<vmem>>) attributes {dimension_semantics = [#tpu.dimension_semantics<parallel>], iteration_bounds = array<i64: 1>, scalar_prefetch = 0 : i64, scratch_operands = 2 : i64, tpu.core_type = #tpu.core_type<tc>, window_params = [{transform_indices = @transform_0, window_bounds = array<i64: 2, 64, 36>}, {pipeline_mode = #tpu.pipeline_mode<synchronous>, transform_indices = @transform_1, window_bounds = array<i64: 36, 32>}, {pipeline_mode = #tpu.pipeline_mode<synchronous>, transform_indices = @transform_2, window_bounds = array<i64: 288, 32>}, {pipeline_mode = #tpu.pipeline_mode<synchronous>, transform_indices = @transform_3, window_bounds = array<i64: 288, 32>}, {pipeline_mode = #tpu.pipeline_mode<synchronous>, transform_indices = @transform_4, window_bounds = array<i64: 1, 32>}, {pipeline_mode = #tpu.pipeline_mode<synchronous>, transform_indices = @transform_5, window_bounds = array<i64: 1, 32>}, {pipeline_mode = #tpu.pipeline_mode<synchronous>, transform_indices = @transform_6, window_bounds = array<i64: 1, 32>}, {transform_indices = @transform_7, window_bounds = array<i64: 2, 9, 32>}]} {
    %c0 = arith.constant 0 : index
    %c0_0 = arith.constant 0 : index
    %c0_1 = arith.constant 0 : index
    %0 = vector.load %arg1[%c0, %c0_0, %c0_1] : memref<2x64x36xf32, #tpu.memory_space<vmem>>, vector<2x64x36xf32>
    %1 = vector.shape_cast %0 : vector<2x64x36xf32> to vector<128x36xf32>
    %c0_2 = arith.constant 0 : index
    %c0_3 = arith.constant 0 : index
    %2 = vector.load %arg2[%c0_2, %c0_3] : memref<36x32xf32, #tpu.memory_space<vmem>>, vector<36x32xf32>
    %cst = arith.constant dense<0.000000e+00> : vector<128x32xf32>
    %3 = tpu.matmul %1, %2, %cst {dimension_numbers = #tpu.dot_dimension_numbers<[1], [0], [0], [1], [0, 0, 1, 1], [], []>} : vector<128x36xf32>, vector<36x32xf32>, vector<128x32xf32> -> vector<128x32xf32>
    %c0_4 = arith.constant 0 : index
    %c0_5 = arith.constant 0 : index
    %4 = vector.load %arg5[%c0_4, %c0_5] : memref<1x32xf32, #tpu.memory_space<vmem>>, vector<1x32xf32>
    %5 = vector.broadcast %4 : vector<1x32xf32> to vector<128x32xf32>
    %6 = arith.addf %3, %5 : vector<128x32xf32>
    %cst_6 = arith.constant 0.000000e+00 : f32
    %7 = vector.broadcast %cst_6 : f32 to vector<128x32xf32>
    %8 = arith.maximumf %6, %7 : vector<128x32xf32>
    %9 = vector.shape_cast %8 : vector<128x32xf32> to vector<2x64x32xf32>
    %c0_7 = arith.constant 0 : index
    %c0_8 = arith.constant 0 : index
    %c0_9 = arith.constant 0 : index
    %10 = vector.load %arg9[%c0_7, %c0_8, %c0_9] : memref<2x64x32xf32, #tpu.memory_space<vmem>>, vector<2x64x32xf32>
    tpu.vector_store %arg9[%c0_7, %c0_8, %c0_9], %9 {strides = array<i32>} : memref<2x64x32xf32, #tpu.memory_space<vmem>>, vector<2x64x32xf32>,
    %c0_10 = arith.constant 0 : index
    %c0_11 = arith.constant 0 : index
    %c0_12 = arith.constant 0 : index
    %11 = vector.load %arg9[%c0_10, %c0_11, %c0_12] : memref<2x64x32xf32, #tpu.memory_space<vmem>>, vector<2x48x32xf32>
    %c0_13 = arith.constant 0 : index
    %c1 = arith.constant 1 : index
    %c0_14 = arith.constant 0 : index
    %12 = vector.load %arg9[%c0_13, %c1, %c0_14] : memref<2x64x32xf32, #tpu.memory_space<vmem>>, vector<2x48x32xf32>
    %c0_15 = arith.constant 0 : index
    %c2 = arith.constant 2 : index
    %c0_16 = arith.constant 0 : index
    %13 = vector.load %arg9[%c0_15, %c2, %c0_16] : memref<2x64x32xf32, #tpu.memory_space<vmem>>, vector<2x48x32xf32>
    %c0_17 = arith.constant 0 : index
    %c7 = arith.constant 7 : index
    %c0_18 = arith.constant 0 : index
    %14 = vector.load %arg9[%c0_17, %c7, %c0_18] : memref<2x64x32xf32, #tpu.memory_space<vmem>>, vector<2x48x32xf32>
    %c0_19 = arith.constant 0 : index
    %c8 = arith.constant 8 : index
    %c0_20 = arith.constant 0 : index
    %15 = vector.load %arg9[%c0_19, %c8, %c0_20] : memref<2x64x32xf32, #tpu.memory_space<vmem>>, vector<2x48x32xf32>
    %c0_21 = arith.constant 0 : index
    %c9 = arith.constant 9 : index
    %c0_22 = arith.constant 0 : index
    %16 = vector.load %arg9[%c0_21, %c9, %c0_22] : memref<2x64x32xf32, #tpu.memory_space<vmem>>, vector<2x48x32xf32>
    %c0_23 = arith.constant 0 : index
    %c14 = arith.constant 14 : index
    %c0_24 = arith.constant 0 : index
    %17 = vector.load %arg9[%c0_23, %c14, %c0_24] : memref<2x64x32xf32, #tpu.memory_space<vmem>>, vector<2x48x32xf32>
    %c0_25 = arith.constant 0 : index
    %c15 = arith.constant 15 : index
    %c0_26 = arith.constant 0 : index
    %18 = vector.load %arg9[%c0_25, %c15, %c0_26] : memref<2x64x32xf32, #tpu.memory_space<vmem>>, vector<2x48x32xf32>
    %c0_27 = arith.constant 0 : index
    %c16 = arith.constant 16 : index
    %c0_28 = arith.constant 0 : index
    %19 = vector.load %arg9[%c0_27, %c16, %c0_28] : memref<2x64x32xf32, #tpu.memory_space<vmem>>, vector<2x48x32xf32>
    %20 = tpu.concatenate %11, %12, %13, %14, %15, %16, %17, %18, %19 in 2 : vector<2x48x32xf32>, vector<2x48x32xf32>, vector<2x48x32xf32>, vector<2x48x32xf32>, vector<2x48x32xf32>, vector<2x48x32xf32>, vector<2x48x32xf32>, vector<2x48x32xf32>, vector<2x48x32xf32> -> vector<2x48x288xf32>
    %21 = vector.shape_cast %20 : vector<2x48x288xf32> to vector<96x288xf32>
    %c0_29 = arith.constant 0 : index
    %c0_30 = arith.constant 0 : index
    %22 = vector.load %arg3[%c0_29, %c0_30] : memref<288x32xf32, #tpu.memory_space<vmem>>, vector<288x32xf32>
    %cst_31 = arith.constant dense<0.000000e+00> : vector<96x32xf32>
    %23 = tpu.matmul %21, %22, %cst_31 {dimension_numbers = #tpu.dot_dimension_numbers<[1], [0], [0], [1], [0, 0, 1, 1], [], []>} : vector<96x288xf32>, vector<288x32xf32>, vector<96x32xf32> -> vector<96x32xf32>
    %c0_32 = arith.constant 0 : index
    %c0_33 = arith.constant 0 : index
    %24 = vector.load %arg6[%c0_32, %c0_33] : memref<1x32xf32, #tpu.memory_space<vmem>>, vector<1x32xf32>
    %25 = vector.broadcast %24 : vector<1x32xf32> to vector<96x32xf32>
    %26 = arith.addf %23, %25 : vector<96x32xf32>
    %cst_34 = arith.constant 0.000000e+00 : f32
    %27 = vector.broadcast %cst_34 : f32 to vector<96x32xf32>
    %28 = arith.maximumf %26, %27 : vector<96x32xf32>
    %29 = vector.shape_cast %28 : vector<96x32xf32> to vector<2x48x32xf32>
    %c0_35 = arith.constant 0 : index
    %c0_36 = arith.constant 0 : index
    %c0_37 = arith.constant 0 : index
    %30 = vector.load %arg10[%c0_35, %c0_36, %c0_37] : memref<2x48x32xf32, #tpu.memory_space<vmem>>, vector<2x48x32xf32>
    tpu.vector_store %arg10[%c0_35, %c0_36, %c0_37], %29 {strides = array<i32>} : memref<2x48x32xf32, #tpu.memory_space<vmem>>, vector<2x48x32xf32>,
    %c0_38 = arith.constant 0 : index
    %c0_39 = arith.constant 0 : index
    %c0_40 = arith.constant 0 : index
    %31 = vector.load %arg10[%c0_38, %c0_39, %c0_40] : memref<2x48x32xf32, #tpu.memory_space<vmem>>, vector<2x32x32xf32>
    %c0_41 = arith.constant 0 : index
    %c1_42 = arith.constant 1 : index
    %c0_43 = arith.constant 0 : index
    %32 = vector.load %arg10[%c0_41, %c1_42, %c0_43] : memref<2x48x32xf32, #tpu.memory_space<vmem>>, vector<2x32x32xf32>
    %c0_44 = arith.constant 0 : index
    %c2_45 = arith.constant 2 : index
    %c0_46 = arith.constant 0 : index
    %33 = vector.load %arg10[%c0_44, %c2_45, %c0_46] : memref<2x48x32xf32, #tpu.memory_space<vmem>>, vector<2x32x32xf32>
    %c0_47 = arith.constant 0 : index
    %c7_48 = arith.constant 7 : index
    %c0_49 = arith.constant 0 : index
    %34 = vector.load %arg10[%c0_47, %c7_48, %c0_49] : memref<2x48x32xf32, #tpu.memory_space<vmem>>, vector<2x32x32xf32>
    %c0_50 = arith.constant 0 : index
    %c8_51 = arith.constant 8 : index
    %c0_52 = arith.constant 0 : index
    %35 = vector.load %arg10[%c0_50, %c8_51, %c0_52] : memref<2x48x32xf32, #tpu.memory_space<vmem>>, vector<2x32x32xf32>
    %c0_53 = arith.constant 0 : index
    %c9_54 = arith.constant 9 : index
    %c0_55 = arith.constant 0 : index
    %36 = vector.load %arg10[%c0_53, %c9_54, %c0_55] : memref<2x48x32xf32, #tpu.memory_space<vmem>>, vector<2x32x32xf32>
    %c0_56 = arith.constant 0 : index
    %c14_57 = arith.constant 14 : index
    %c0_58 = arith.constant 0 : index
    %37 = vector.load %arg10[%c0_56, %c14_57, %c0_58] : memref<2x48x32xf32, #tpu.memory_space<vmem>>, vector<2x32x32xf32>
    %c0_59 = arith.constant 0 : index
    %c15_60 = arith.constant 15 : index
    %c0_61 = arith.constant 0 : index
    %38 = vector.load %arg10[%c0_59, %c15_60, %c0_61] : memref<2x48x32xf32, #tpu.memory_space<vmem>>, vector<2x32x32xf32>
    %c0_62 = arith.constant 0 : index
    %c16_63 = arith.constant 16 : index
    %c0_64 = arith.constant 0 : index
    %39 = vector.load %arg10[%c0_62, %c16_63, %c0_64] : memref<2x48x32xf32, #tpu.memory_space<vmem>>, vector<2x32x32xf32>
    %40 = tpu.concatenate %31, %32, %33, %34, %35, %36, %37, %38, %39 in 2 : vector<2x32x32xf32>, vector<2x32x32xf32>, vector<2x32x32xf32>, vector<2x32x32xf32>, vector<2x32x32xf32>, vector<2x32x32xf32>, vector<2x32x32xf32>, vector<2x32x32xf32>, vector<2x32x32xf32> -> vector<2x32x288xf32>
    %41 = vector.shape_cast %40 : vector<2x32x288xf32> to vector<64x288xf32>
    %c0_65 = arith.constant 0 : index
    %c0_66 = arith.constant 0 : index
    %42 = vector.load %arg4[%c0_65, %c0_66] : memref<288x32xf32, #tpu.memory_space<vmem>>, vector<288x32xf32>
    %cst_67 = arith.constant dense<0.000000e+00> : vector<64x32xf32>
    %43 = tpu.matmul %41, %42, %cst_67 {dimension_numbers = #tpu.dot_dimension_numbers<[1], [0], [0], [1], [0, 0, 1, 1], [], []>} : vector<64x288xf32>, vector<288x32xf32>, vector<64x32xf32> -> vector<64x32xf32>
    %c0_68 = arith.constant 0 : index
    %c0_69 = arith.constant 0 : index
    %44 = vector.load %arg7[%c0_68, %c0_69] : memref<1x32xf32, #tpu.memory_space<vmem>>, vector<1x32xf32>
    %45 = vector.broadcast %44 : vector<1x32xf32> to vector<64x32xf32>
    %46 = arith.addf %43, %45 : vector<64x32xf32>
    %47 = vector.shape_cast %46 : vector<64x32xf32> to vector<2x32x32xf32>
    %48 = vector.extract_strided_slice %47 {offsets = [0, 0, 0], sizes = [2, 3, 32], strides = [1, 1, 1]} : vector<2x32x32xf32> to vector<2x3x32xf32>
    %c0_70 = arith.constant 0 : index
    %c0_71 = arith.constant 0 : index
    %c0_72 = arith.constant 0 : index
    %49 = vector.load %arg8[%c0_70, %c0_71, %c0_72] : memref<2x9x32xf32, #tpu.memory_space<vmem>>, vector<2x3x32xf32>
    tpu.vector_store %arg8[%c0_70, %c0_71, %c0_72], %48 {strides = array<i32>} : memref<2x9x32xf32, #tpu.memory_space<vmem>>, vector<2x3x32xf32>,
    %50 = vector.extract_strided_slice %47 {offsets = [0, 7, 0], sizes = [2, 3, 32], strides = [1, 1, 1]} : vector<2x32x32xf32> to vector<2x3x32xf32>
    %c0_73 = arith.constant 0 : index
    %c3 = arith.constant 3 : index
    %c0_74 = arith.constant 0 : index
    %51 = vector.load %arg8[%c0_73, %c3, %c0_74] : memref<2x9x32xf32, #tpu.memory_space<vmem>>, vector<2x3x32xf32>
    tpu.vector_store %arg8[%c0_73, %c3, %c0_74], %50 {strides = array<i32>} : memref<2x9x32xf32, #tpu.memory_space<vmem>>, vector<2x3x32xf32>,
    %52 = vector.extract_strided_slice %47 {offsets = [0, 14, 0], sizes = [2, 3, 32], strides = [1, 1, 1]} : vector<2x32x32xf32> to vector<2x3x32xf32>
    %c0_75 = arith.constant 0 : index
    %c6 = arith.constant 6 : index
    %c0_76 = arith.constant 0 : index
    %53 = vector.load %arg8[%c0_75, %c6, %c0_76] : memref<2x9x32xf32, #tpu.memory_space<vmem>>, vector<2x3x32xf32>
    tpu.vector_store %arg8[%c0_75, %c6, %c0_76], %52 {strides = array<i32>} : memref<2x9x32xf32, #tpu.memory_space<vmem>>, vector<2x3x32xf32>,
    return
  }
  func.func @transform_0(%arg0: i32) -> (i32, i32, i32) {
    %c0_i32 = arith.constant 0 : i32
    %c0_i32_0 = arith.constant 0 : i32
    %c0_i32_1 = arith.constant 0 : i32
    return %arg0, %c0_i32, %c0_i32_0 : i32, i32, i32
  }
  func.func @transform_1(%arg0: i32) -> (i32, i32) {
    %c0_i32 = arith.constant 0 : i32
    %c0_i32_0 = arith.constant 0 : i32
    %c0_i32_1 = arith.constant 0 : i32
    return %c0_i32, %c0_i32_0 : i32, i32
  }
  func.func @transform_2(%arg0: i32) -> (i32, i32) {
    %c0_i32 = arith.constant 0 : i32
    %c0_i32_0 = arith.constant 0 : i32
    %c0_i32_1 = arith.constant 0 : i32
    return %c0_i32, %c0_i32_0 : i32, i32
  }
  func.func @transform_3(%arg0: i32) -> (i32, i32) {
    %c0_i32 = arith.constant 0 : i32
    %c0_i32_0 = arith.constant 0 : i32
    %c0_i32_1 = arith.constant 0 : i32
    return %c0_i32, %c0_i32_0 : i32, i32
  }
  func.func @transform_4(%arg0: i32) -> (i32, i32) {
    %c0_i32 = arith.constant 0 : i32
    %c0_i32_0 = arith.constant 0 : i32
    %c0_i32_1 = arith.constant 0 : i32
    return %c0_i32, %c0_i32_0 : i32, i32
  }
  func.func @transform_5(%arg0: i32) -> (i32, i32) {
    %c0_i32 = arith.constant 0 : i32
    %c0_i32_0 = arith.constant 0 : i32
    %c0_i32_1 = arith.constant 0 : i32
    return %c0_i32, %c0_i32_0 : i32, i32
  }
  func.func @transform_6(%arg0: i32) -> (i32, i32) {
    %c0_i32 = arith.constant 0 : i32
    %c0_i32_0 = arith.constant 0 : i32
    %c0_i32_1 = arith.constant 0 : i32
    return %c0_i32, %c0_i32_0 : i32, i32
  }
  func.func @transform_7(%arg0: i32) -> (i32, i32, i32) {
    %c0_i32 = arith.constant 0 : i32
    %c0_i32_0 = arith.constant 0 : i32
    %c0_i32_1 = arith.constant 0 : i32
    return %arg0, %c0_i32, %c0_i32_0 : i32, i32, i32
  }
}

</mosaic_0001>

<bundles_post_ra>
// kernel: shared_cnn_forward.1
= control target key start
LH: loop header
LB: loop body
LE: loop exit
PB: predicated region body
PF: predicated region fallthrough
CT: control target
= control target key end

     0   :  { %vm54_vm0 = vcmask 293888   ;;  %vm103_vm1 = vcmask 1043456   ;;  %vm268_vm2 = vcmask 261120   ;;  %s2089_s17 = smov 32   ;;  %s2090_s18 = smov 64   ;;  %vm573_vm3 = vcmask 523264   ;;  %s2807_s1 = inlined_call_operand.vmem [shape: f32[36,32], index: 1, kind: input, shape index: {}]   ;;  %s2808_s0 = inlined_call_operand.vmem [shape: f32[2,64,36], index: 0, kind: input, shape index: {}]   ;;  %s2809_s2 = inlined_call_operand.vmem [shape: f32[288,32], index: 2, kind: input, shape index: {}]   ;;  %s2810_s4 = inlined_call_operand.vmem [shape: f32[1,32], index: 4, kind: input, shape index: {}]   ;;  %s2811_s3 = inlined_call_operand.vmem [shape: f32[288,32], index: 3, kind: input, shape index: {}]   ;;  %s2812_s5 = inlined_call_operand.vmem [shape: f32[1,32], index: 5, kind: input, shape index: {}]   ;;  %s2813_s6 = inlined_call_operand.vmem [shape: f32[1,32], index: 6, kind: input, shape index: {}]   ;;  %s2814_s7 = inlined_call_operand.vmem [shape: f32[2,9,32], index: 7, kind: output, shape index: {}]  }
   0x1   :  { %v42_v0 = vld [vmem:[%s2807_s1] sm:$0xff]  ;;  %v43_v1 = vld [vmem:[%s2807_s1 + $0x8] sm:$0xff]  ;;  %v44_v2 = vld [vmem:[%s2807_s1 + $0x10] sm:$0xff]  ;;  %vm586_vm4 = vcmask 785408   ;;  %vm1485_vm5 = vcmask 256000   ;;  %vm1488_vm6 = vcmask 261127  }
   0x2   :  { %v1797_v3 = vpack.c.bf16 %v43_v1, %v42_v0  ;;  %v45_v4 = vld [vmem:[%s2807_s1 + $0x18] sm:$0xff]  ;;  %v26_v5 = vld [vmem:[%s2808_s0] sm:$0xff]  ;;  %v27_v8 = vld [vmem:[%s2808_s0 + $0x8] sm:$0xff]  ;;  %vm1490_vm7 = vcmask 254976   ;;  %vm1494_vm8 = vcmask 261126   ;;  %vm1496_vm9 = vcmask 253952  }
   0x3   :  { %v1801_v6 = vpack.c.bf16 %v45_v4, %v44_v2  ;;  %1727 = vmatprep.mubr.msk.f32.mxu0 %vm54_vm0, %v26_v5  ;;  %v46_v7 = vld [vmem:[%s2807_s1 + $0x20] sm:$0xf]  ;;  %v28_v9 = vld [vmem:[%s2808_s0 + $0x10] sm:$0xff]  ;;  %v29_v10 = vld [vmem:[%s2808_s0 + $0x18] sm:$0xff] }
   0x4   :  { %1798 = vmatprep.subr.bf16.mxu0 %v1797_v3  ;;  %v30_v11 = vld [vmem:[%s2808_s0 + $0x20] sm:$0xff]  ;;  %v31_v12 = vld [vmem:[%s2808_s0 + $0x28] sm:$0xff]  ;;  %v32_v13 = vld [vmem:[%s2808_s0 + $0x30] sm:$0xff] }
   0x5   :  { %1800 = vmatpush3.bf16.msra.mxu0 %v1797_v3  ;;  %v33_v14 = vld [vmem:[%s2808_s0 + $0x38] sm:$0xff]  ;;  %v34_v15 = vld [vmem:[%s2808_s0 + $0x40] sm:$0xff]  ;;  %v35_v16 = vld [vmem:[%s2808_s0 + $0x48] sm:$0xff] }
   0x6   :  { %1802 = vmatprep.subr.bf16.mxu0 %v1801_v6  ;;  %v36_v17 = vld [vmem:[%s2808_s0 + $0x50] sm:$0xff]  ;;  %v37_v18 = vld [vmem:[%s2808_s0 + $0x58] sm:$0xff]  ;;  %v38_v19 = vld [vmem:[%s2808_s0 + $0x60] sm:$0xff] }
   0x7   :  { %v39_v20 = vld [vmem:[%s2808_s0 + $0x68] sm:$0xff]  ;;  %v40_v21 = vld [vmem:[%s2808_s0 + $0x70] sm:$0xff]  ;;  %v41_v22 = vld [vmem:[%s2808_s0 + $0x78] sm:$0xff] }
   0x8   :  { %v657_v23 = vld [vmem:[%s2809_s2 + $0x100] sm:$0xff]  ;;  %v658_v24 = vld [vmem:[%s2809_s2 + $0x108] sm:$0xff]  ;;  %v659_v26 = vld [vmem:[%s2809_s2 + $0x110] sm:$0xff] }
   0x9   :  { %1804 = vmatpush3.bf16.msra.mxu0 %v1801_v6  ;;  %v1837_v25 = vpack.c.bf16 %v658_v24, %v657_v23  ;;  %v660_v27 = vld [vmem:[%s2809_s2 + $0x118] sm:$0xff]  ;;  %v641_v29 = vld [vmem:[%s2809_s2 + $0x80] sm:$0xff]  ;;  %v642_v30 = vld [vmem:[%s2809_s2 + $0x88] sm:$0xff] }
   0xa   :  { %1725 = vmatprep.subr.msk.mxu0 %vm103_vm1, %v46_v7  ;;  %v1841_v28 = vpack.c.bf16 %v660_v27, %v659_v26  ;;  %v625_v31 = vld [vmem:[%s2809_s2] sm:$0xff]  ;;  %v1805_v32 = vpack.c.bf16 %v642_v30, %v641_v29  ;;  %v626_v33 = vld [vmem:[%s2809_s2 + $0x8] sm:$0xff]  ;;  %v643_v34 = vld [vmem:[%s2809_s2 + $0x90] sm:$0xff] }
   0xb   :  { %v644_v35 = vld [vmem:[%s2809_s2 + $0x98] sm:$0xff]  ;;  %v1807_v36 = vpack.c.bf16 %v626_v33, %v625_v31  ;;  %v627_v38 = vld [vmem:[%s2809_s2 + $0x10] sm:$0xff]  ;;  %v645_v40 = vld [vmem:[%s2809_s2 + $0xa0] sm:$0xff] }
   0xc   :  { %v1809_v37 = vpack.c.bf16 %v644_v35, %v643_v34  ;;  %v628_v39 = vld [vmem:[%s2809_s2 + $0x18] sm:$0xff]  ;;  %1806 = vmatprep.subr.bf16.mxu1 %v1805_v32  ;;  %v646_v41 = vld [vmem:[%s2809_s2 + $0xa8] sm:$0xff]  ;;  %v629_v44 = vld [vmem:[%s2809_s2 + $0x20] sm:$0xff] }
   0xd   :  { %1726 = vmatpush3.msk.msra.mxu0 %vm103_vm1, %v46_v7  ;;  %1808 = vmatpush3.bf16.msra.mxu1 %v1807_v36  ;;  %v1811_v42 = vpack.c.bf16 %v628_v39, %v627_v38  ;;  %v1813_v43 = vpack.c.bf16 %v646_v41, %v645_v40  ;;  %v630_v45 = vld [vmem:[%s2809_s2 + $0x28] sm:$0xff]  ;;  %v647_v46 = vld [vmem:[%s2809_s2 + $0xb0] sm:$0xff]  ;;  %v648_v47 = vld [vmem:[%s2809_s2 + $0xb8] sm:$0xff] }
   0xe   :  { %1728 = vmatmul.mubr.msk.f32.vlgmr.msra.gmra.mrb[0].mxu0 %vm54_vm0, %v27_v8  ;;  %1838 = vmatprep.subr.bf16.mxu0 %v1837_v25  ;;  %v1815_v48 = vpack.c.bf16 %v630_v45, %v629_v44  ;;  %v1817_v49 = vpack.c.bf16 %v648_v47, %v647_v46  ;;  %v631_v50 = vld [vmem:[%s2809_s2 + $0x30] sm:$0xff]  ;;  %v632_v51 = vld [vmem:[%s2809_s2 + $0x38] sm:$0xff]  ;;  %v649_v52 = vld [vmem:[%s2809_s2 + $0xc0] sm:$0xff] }
   0xf   :  { %1730 = vmatprep.mubr.msk.f32.mxu0 %vm54_vm0, %v28_v9  ;;  %1840 = vmatpush3.bf16.msra.mxu0 %v1837_v25  ;;  %v650_v53 = vld [vmem:[%s2809_s2 + $0xc8] sm:$0xff]  ;;  %v1819_v54 = vpack.c.bf16 %v632_v51, %v631_v50  ;;  %v633_v56 = vld [vmem:[%s2809_s2 + $0x40] sm:$0xff]  ;;  %v651_v58 = vld [vmem:[%s2809_s2 + $0xd0] sm:$0xff] }
  0x10   :  { %1842 = vmatprep.subr.bf16.mxu0 %v1841_v28  ;;  %1810 = vmatprep.subr.bf16.mxu1 %v1809_v37  ;;  %v1821_v55 = vpack.c.bf16 %v650_v53, %v649_v52  ;;  %v634_v57 = vld [vmem:[%s2809_s2 + $0x48] sm:$0xff]  ;;  %v652_v59 = vld [vmem:[%s2809_s2 + $0xd8] sm:$0xff]  ;;  %v635_v62 = vld [vmem:[%s2809_s2 + $0x50] sm:$0xff] }
  0x11   :  { %1812 = vmatpush3.bf16.msra.mxu1 %v1811_v42  ;;  %v1823_v60 = vpack.c.bf16 %v634_v57, %v633_v56  ;;  %v1825_v61 = vpack.c.bf16 %v652_v59, %v651_v58  ;;  %v636_v63 = vld [vmem:[%s2809_s2 + $0x58] sm:$0xff]  ;;  %v2297_v1 = vld [vmem:[%s2810_s4] ss:$0 sm:$0xff]  ;;  %v655_v25 = vld [vmem:[%s2809_s2 + $0xf0] sm:$0xff] }
  0x12   :  { %1731 = vmatmul.mubr.msk.f32.gmra.mrb[2].mxu0 %vm54_vm0, %v29_v10  ;;  %1814 = vmatprep.subr.bf16.mxu1 %v1813_v43  ;;  %v1827_v0 = vpack.c.bf16 %v636_v63, %v635_v62  ;;  %v656_v26 = vld [vmem:[%s2809_s2 + $0xf8] sm:$0xff]  ;;  %v639_v27 = vld [vmem:[%s2809_s2 + $0x70] sm:$0xff] }
  0x13   :  { %1733 = vmatprep.mubr.msk.f32.mxu0 %vm54_vm0, %v30_v11  ;;  %1844 = vmatpush3.bf16.msra.mxu0 %v1841_v28  ;;  %v1833_v30 = vpack.c.bf16 %v656_v26, %v655_v25  ;;  %v640_v31 = vld [vmem:[%s2809_s2 + $0x78] sm:$0xff] }
  0x14   :  { %v1835_v34 = vpack.c.bf16 %v640_v31, %v639_v27 }
  0x15   :  { %1816 = vmatpush3.bf16.msra.mxu1 %v1815_v48 }
  0x16   :  { %1734 = vmatmul.mubr.msk.f32.gmra.mrb[4].mxu0 %vm54_vm0, %v31_v12  ;;  %1818 = vmatprep.subr.bf16.mxu1 %v1817_v49 }
  0x17   :  { %1736 = vmatprep.mubr.msk.f32.mxu0 %vm54_vm0, %v32_v13  ;;  %v653_v13 = vld [vmem:[%s2809_s2 + $0xe0] sm:$0xff] }
  0x19   :  { %1820 = vmatpush3.bf16.msra.mxu1 %v1819_v54 }
  0x1a   :  { %1737 = vmatmul.mubr.msk.f32.gmra.mrb[6].mxu0 %vm54_vm0, %v33_v14  ;;  %1822 = vmatprep.subr.bf16.mxu1 %v1821_v55  ;;  %v654_v14 = vld [vmem:[%s2809_s2 + $0xe8] sm:$0xff] }
  0x1b   :  { %1739 = vmatprep.mubr.msk.f32.mxu0 %vm54_vm0, %v34_v15  ;;  %v637_v15 = vld [vmem:[%s2809_s2 + $0x60] sm:$0xff] }
  0x1d   :  { %1824 = vmatpush3.bf16.msra.mxu1 %v1823_v60 }
  0x1e   :  { %1740 = vmatmul.mubr.msk.f32.gmra.mrb[8].mxu0 %vm54_vm0, %v35_v16  ;;  %1826 = vmatprep.subr.bf16.mxu1 %v1825_v61 }
  0x1f   :  { %1742 = vmatprep.mubr.msk.f32.mxu0 %vm54_vm0, %v36_v17 }
  0x21   :  { %1828 = vmatpush3.bf16.msra.mxu1 %v1827_v0 }
  0x22   :  { %1743 = vmatmul.mubr.msk.f32.gmra.mrb[10].mxu0 %vm54_vm0, %v37_v18  ;;  %v1829_v18 = vpack.c.bf16 %v654_v14, %v653_v13 }
  0x23   :  { %1745 = vmatprep.mubr.msk.f32.mxu0 %vm54_vm0, %v38_v19  ;;  %v638_v19 = vld [vmem:[%s2809_s2 + $0x68] sm:$0xff]  ;;  %s2088_s2 = smov 96  }
  0x24   :  { %1830 = vmatprep.subr.bf16.mxu1 %v1829_v18 }
  0x26   :  { %1746 = vmatmul.mubr.msk.f32.gmra.mrb[12].mxu0 %vm54_vm0, %v39_v20 }
  0x27   :  { %1748 = vmatprep.mubr.msk.f32.mxu0 %vm54_vm0, %v40_v21 }
  0x2a   :  { %1749 = vmatmul.mubr.msk.f32.gmra.mrb[14].mxu0 %vm54_vm0, %v41_v22  ;;  %v1831_v22 = vpack.c.bf16 %v638_v19, %v637_v15 }
  0x2c   :  { %1832 = vmatpush3.bf16.msra.mxu1 %v1831_v22 }
  0x2d   :  { %1834 = vmatprep.subr.bf16.mxu1 %v1833_v30 }
  0x30   :  { %1836 = vmatpush3.bf16.msra.mxu1 %v1835_v34 }
  0xe1   :  { %v1729_v2 = vpop.f32.mrb[0].mxu0 }
  0xe2   :  { %v179_v3 = vadd.f32 %v1729_v2, %v2297_v1  ;;  %v173_v4 = vpop.f32.mrb[1].mxu0 }
  0xe3   :  { %v174_v5 = vadd.f32 %v2297_v1, %v173_v4 }
  0xe4   :  { %v253_v6 = vmax.f32 %v179_v3, 0.0 }
  0xe5   :  { %v252_v7 = vmax.f32 %v174_v5, 0.0  ;;  %v1732_v8 = vpop.f32.mrb[2].mxu0 }
  0xe6   :  { %270 = vst.msk [vmem:[#allocation2 + $0x8] sm:$0xff] %vm268_vm2, %v253_v6  ;;  %v189_v9 = vadd.f32 %v1732_v8, %v2297_v1  ;;  %v183_v10 = vpop.f32.mrb[3].mxu0 }
  0xe7   :  { %269 = vst.msk [vmem:[#allocation2] sm:$0xff] %vm268_vm2, %v252_v7  ;;  %v184_v11 = vadd.f32 %v2297_v1, %v183_v10 }
  0xe8   :  { %v255_v12 = vmax.f32 %v189_v9, 0.0 }
  0xe9   :  { %v254_v16 = vmax.f32 %v184_v11, 0.0  ;;  %v1735_v17 = vpop.f32.mrb[4].mxu0 }
  0xea   :  { %272 = vst.msk [vmem:[#allocation2 + $0x18] sm:$0xff] %vm268_vm2, %v255_v12  ;;  %v199_v20 = vadd.f32 %v1735_v17, %v2297_v1  ;;  %v193_v21 = vpop.f32.mrb[5].mxu0 }
  0xeb   :  { %271 = vst.msk [vmem:[#allocation2 + $0x10] sm:$0xff] %vm268_vm2, %v254_v16  ;;  %v194_v23 = vadd.f32 %v2297_v1, %v193_v21 }
  0xec   :  { %v257_v24 = vmax.f32 %v199_v20, 0.0 }
  0xed   :  { %v256_v28 = vmax.f32 %v194_v23, 0.0  ;;  %v1738_v29 = vpop.f32.mrb[6].mxu0 }
  0xee   :  { %274 = vst.msk [vmem:[#allocation2 + $0x28] sm:$0xff] %vm268_vm2, %v257_v24  ;;  %v209_v32 = vadd.f32 %v1738_v29, %v2297_v1  ;;  %v203_v33 = vpop.f32.mrb[7].mxu0  ;;  %v321_v39 = vld [vmem:[#allocation2 + $0x7] sm:$0xff] }
  0xef   :  { %273 = vst.msk [vmem:[#allocation2 + $0x20] sm:$0xff] %vm268_vm2, %v256_v28  ;;  %v204_v35 = vadd.f32 %v2297_v1, %v203_v33  ;;  %v297_v40 = vld [vmem:[#allocation2 + $0x1] sm:$0xff] }
  0xf0   :  { %v259_v36 = vmax.f32 %v209_v32, 0.0  ;;  %v309_v55 = vld [vmem:[#allocation2 + $0x2] sm:$0xff] }
  0xf1   :  { %v258_v37 = vmax.f32 %v204_v35, 0.0  ;;  %v1741_v38 = vpop.f32.mrb[8].mxu0  ;;  %v2345_v47 = vld [vmem:[#allocation2 + $0x18] sm:$0xff] }
  0xf2   :  { %276 = vst.msk [vmem:[#allocation2 + $0x38] sm:$0xff] %vm268_vm2, %v259_v36  ;;  %v219_v41 = vadd.f32 %v1741_v38, %v2297_v1  ;;  %v2339_v42 = vld [vmem:[#allocation2 + $0x10] sm:$0xff]  ;;  %v213_v43 = vpop.f32.mrb[9].mxu0 }
  0xf3   :  { %v322_v44 = vld [vmem:[#allocation2 + $0xf] sm:$0xff]  ;;  %275 = vst.msk [vmem:[#allocation2 + $0x30] sm:$0xff] %vm268_vm2, %v258_v37  ;;  %1759 = vmatprep.mubr.msk.f32.mxu0 %vm268_vm2, %v2339_v42  ;;  %v214_v46 = vadd.f32 %v2297_v1, %v213_v43  ;;  %v323_v10 = vld [vmem:[#allocation2 + $0x17] sm:$0xff] }
  0xf4   :  { %v298_v45 = vld [vmem:[#allocation2 + $0x9] sm:$0xff]  ;;  %v1898_v48 = vpack.i.bf16 %v321_v39, %v322_v44  ;;  %v261_v50 = vmax.f32 %v219_v41, 0.0  ;;  %1760 = vmatmul.mubr.msk.f32.vlgmr.msra.gmra.mrb[16].mxu0 %vm268_vm2, %v2345_v47  ;;  %v299_v59 = vld [vmem:[#allocation2 + $0x11] sm:$0xff] }
  0xf5   :  { %v1888_v49 = vpack.i.bf16 %v297_v40, %v298_v45  ;;  %v337_v51 = vld [vmem:[#allocation2 + $0xe] sm:$0xff]  ;;  %v260_v52 = vmax.f32 %v214_v46, 0.0  ;;  %v1744_v53 = vpop.f32.mrb[10].mxu0  ;;  %v338_v4 = vld [vmem:[#allocation2 + $0x16] sm:$0xff] }
  0xf6   :  { %1899 = vrot.lane.b32.xlu1 %v1898_v48, %s2088_s2  ;;  %v2351_v54 = vld [vmem:[#allocation2 + $0x28] sm:$0xff]  ;;  %278 = vst.msk [vmem:[#allocation2 + $0x48] sm:$0xff] %vm268_vm2, %v261_v50  ;;  %v229_v56 = vadd.f32 %v1744_v53, %v2297_v1  ;;  %v223_v57 = vpop.f32.mrb[11].mxu0  ;;  %v2355_v58 = vld [vmem:[#allocation2 + $0x20] sm:$0xff]  ;;  %v1893_v63 = vpack.i.bf16 %v309_v55, %v337_v51  ;;  %v311_v21 = vld [vmem:[#allocation2 + $0x12] sm:$0xff] }
  0xf7   :  { %1889 = vrot.lane.b32.xlu0 %v1888_v49, %s2089_s17  ;;  %v300_v60 = vld [vmem:[#allocation2 + $0x19] sm:$0xff]  ;;  %277 = vst.msk [vmem:[#allocation2 + $0x40] sm:$0xff] %vm268_vm2, %v260_v52  ;;  %v224_v61 = vadd.f32 %v2297_v1, %v223_v57  ;;  %1762 = vmatprep.mubr.msk.f32.mxu0 %vm268_vm2, %v2355_v58  ;;  %v310_v3 = vld [vmem:[#allocation2 + $0xa] sm:$0xff]  ;;  %v301_v20 = vld [vmem:[#allocation2 + $0x21] sm:$0xff] }
  0xf8   :  { %v1908_v62 = vpack.i.bf16 %v300_v60, %v299_v59  ;;  %v263_v0 = vmax.f32 %v229_v56, 0.0  ;;  %1763 = vmatmul.mubr.msk.f32.gmra.mrb[18].mxu0 %vm268_vm2, %v2351_v54  ;;  %v324_v2 = vld [vmem:[#allocation2 + $0x1f] sm:$0xff]  ;;  %v1903_v14 = vpack.i.bf16 %v310_v3, %v338_v4  ;;  %v325_v33 = vld [vmem:[#allocation2 + $0x27] sm:$0xff] }
  0xf9   :  { %v262_v5 = vmax.f32 %v224_v61, 0.0  ;;  %v1747_v6 = vpop.f32.mrb[12].mxu0  ;;  %v351_v7 = vld [vmem:[#allocation2 + $0x38] sm:$0xff]  ;;  %v1913_v13 = vpack.i.bf16 %v324_v2, %v323_v10  ;;  %v340_v29 = vld [vmem:[#allocation2 + $0x26] sm:$0xff] }
  0xfa   :  { %1909 = vrot.lane.b32.xlu1 %v1908_v62, %s2089_s17  ;;  %280 = vst.msk [vmem:[#allocation2 + $0x58] sm:$0xff] %vm268_vm2, %v263_v0  ;;  %v239_v8 = vadd.f32 %v1747_v6, %v2297_v1  ;;  %v233_v9 = vpop.f32.mrb[13].mxu0  ;;  %v2367_v11 = vld [vmem:[#allocation2 + $0x30] sm:$0xff]  ;;  %v339_v17 = vld [vmem:[#allocation2 + $0x1e] sm:$0xff] }
  0xfb   :  { %1894 = vrot.lane.b32.xlu0 %v1893_v63, %s2090_s18  ;;  %279 = vst.msk [vmem:[#allocation2 + $0x50] sm:$0xff] %vm268_vm2, %v262_v5  ;;  %v234_v12 = vadd.f32 %v2297_v1, %v233_v9  ;;  %1765 = vmatprep.mubr.msk.f32.mxu0 %vm268_vm2, %v2367_v11  ;;  %v302_v16 = vld [vmem:[#allocation2 + $0x29] sm:$0xff]  ;;  %v1918_v25 = vpack.i.bf16 %v311_v21, %v339_v17  ;;  %v312_v28 = vld [vmem:[#allocation2 + $0x1a] sm:$0xff]  ;;  %v335_v39 = vld [vmem:[#allocation2 + $0x31] sm:$0xff] }
  0xfc   :  { %v265_v15 = vmax.f32 %v239_v8, 0.0  ;;  %1766 = vmatmul.mubr.msk.f32.gmra.mrb[20].mxu0 %vm268_vm2, %v351_v7  ;;  %v1928_v24 = vpack.i.bf16 %v302_v16, %v301_v20  ;;  %v326_v27 = vld [vmem:[#allocation2 + $0x2f] sm:$0xff]  ;;  %v1923_v36 = vpack.i.bf16 %v312_v28, %v340_v29  ;;  %v313_v40 = vld [vmem:[#allocation2 + $0x22] sm:$0xff]  ;;  %v349_v49 = vld [vmem:[#allocation2 + $0x37] sm:$0xff] }
  0xfd   :  { %v264_v18 = vmax.f32 %v234_v12, 0.0  ;;  %v1750_v19 = vpop.f32.mrb[14].mxu0  ;;  %v1933_v35 = vpack.i.bf16 %v326_v27, %v325_v33  ;;  %v341_v37 = vld [vmem:[#allocation2 + $0x2e] sm:$0xff]  ;;  %v342_v48 = vld [vmem:[#allocation2 + $0x36] sm:$0xff] }
  0xfe   :  { %1914 = vrot.lane.b32.xlu1 %v1913_v13, %s2088_s2  ;;  %282 = vst.msk [vmem:[#allocation2 + $0x68] sm:$0xff] %vm268_vm2, %v265_v15  ;;  %v249_v22 = vadd.f32 %v1750_v19, %v2297_v1  ;;  %v243_v23 = vpop.f32.mrb[15].mxu0  ;;  %v1938_v44 = vpack.i.bf16 %v313_v40, %v341_v37  ;;  %v314_v46 = vld [vmem:[#allocation2 + $0x2a] sm:$0xff]  ;;  %v315_v52 = vld [vmem:[#allocation2 + $0x42] sm:$0xff] }
  0xff   :  { %1904 = vrot.lane.b32.xlu0 %v1903_v14, %s2090_s18  ;;  %281 = vst.msk [vmem:[#allocation2 + $0x60] sm:$0xff] %vm268_vm2, %v264_v18  ;;  %v244_v26 = vadd.f32 %v2297_v1, %v243_v23  ;;  %v1943_v51 = vpack.i.bf16 %v314_v46, %v342_v48  ;;  %v303_v57 = vld [vmem:[#allocation2 + $0x41] sm:$0xff] }
 0x100   :  { %v267_v30 = vmax.f32 %v249_v22, 0.0  ;;  %v327_v62 = vld [vmem:[#allocation2 + $0x47] sm:$0xff] }
 0x101   :  { %v2382_v31 = vld [vmem:[#allocation2 + $0x58] sm:$0xff]  ;;  %v266_v32 = vmax.f32 %v244_v26, 0.0  ;;  %v285_v40 = vld [vmem:[#allocation2] sm:$0xff] }
 0x102   :  { %1929 = vrot.lane.b32.xlu1 %v1928_v24, %s2089_s17  ;;  %v2384_v34 = vld [vmem:[#allocation2 + $0x50] sm:$0xff]  ;;  %284 = vst.msk [vmem:[#allocation2 + $0x78] sm:$0xff] %vm268_vm2, %v267_v30 }
 0x103   :  { %1919 = vrot.lane.b32.xlu0 %v1918_v25, %s2090_s18  ;;  %1768 = vmatprep.mubr.msk.f32.mxu0 %vm268_vm2, %v2384_v34  ;;  %283 = vst.msk [vmem:[#allocation2 + $0x70] sm:$0xff] %vm268_vm2, %v266_v32  ;;  %v304_v1 = vld [vmem:[#allocation2 + $0x49] sm:$0xff]  ;;  %v305_v59 = vld [vmem:[#allocation2 + $0x51] sm:$0xff] }
 0x104   :  { %1769 = vmatmul.mubr.msk.f32.gmra.mrb[22].mxu0 %vm268_vm2, %v2382_v31  ;;  %v1948_v43 = vpack.i.bf16 %v304_v1, %v335_v39  ;;  %v328_v45 = vld [vmem:[#allocation2 + $0x4f] sm:$0xff]  ;;  %v1958_v61 = vpack.i.bf16 %v305_v59, %v303_v57  ;;  %v329_v2 = vld [vmem:[#allocation2 + $0x57] sm:$0xff] }
 0x105   :  { %v2394_v38 = vld [vmem:[#allocation2 + $0x68] sm:$0xff]  ;;  %v1953_v50 = vpack.i.bf16 %v328_v45, %v349_v49  ;;  %v344_v0 = vld [vmem:[#allocation2 + $0x56] sm:$0xff]  ;;  %v1968_v4 = vpack.i.bf16 %v329_v2, %v327_v62 }
 0x106   :  { %1934 = vrot.lane.b32.xlu1 %v1933_v35, %s2088_s2  ;;  %v2396_v41 = vld [vmem:[#allocation2 + $0x60] sm:$0xff]  ;;  %v343_v56 = vld [vmem:[#allocation2 + $0x4e] sm:$0xff] }
 0x107   :  { %1924 = vrot.lane.b32.xlu0 %v1923_v36, %s2090_s18  ;;  %1771 = vmatprep.mubr.msk.f32.mxu0 %vm268_vm2, %v2396_v41  ;;  %v1963_v60 = vpack.i.bf16 %v315_v52, %v343_v56  ;;  %v316_v63 = vld [vmem:[#allocation2 + $0x4a] sm:$0xff]  ;;  %v317_v5 = vld [vmem:[#allocation2 + $0x52] sm:$0xff]  ;;  %v345_v6 = vld [vmem:[#allocation2 + $0x5e] sm:$0xff] }
 0x108   :  { %1772 = vmatmul.mubr.msk.f32.gmra.mrb[24].mxu0 %vm268_vm2, %v2394_v38  ;;  %v1973_v3 = vpack.i.bf16 %v316_v63, %v344_v0  ;;  %v306_v7 = vld [vmem:[#allocation2 + $0x59] sm:$0xff]  ;;  %v307_v8 = vld [vmem:[#allocation2 + $0x61] sm:$0xff]  ;;  %v1983_v9 = vpack.i.bf16 %v317_v5, %v345_v6 }
 0x109   :  { %v352_v55 = vld [vmem:[#allocation2 + $0x78] sm:$0xff]  ;;  %v1978_v10 = vpack.i.bf16 %v307_v8, %v306_v7  ;;  %v346_v13 = vld [vmem:[#allocation2 + $0x66] sm:$0xff] }
 0x10a   :  { %1949 = vrot.lane.b32.xlu1 %v1948_v43, %s2089_s17  ;;  %v2404_v53 = vld [vmem:[#allocation2 + $0x70] sm:$0xff]  ;;  %v318_v12 = vld [vmem:[#allocation2 + $0x5a] sm:$0xff]  ;;  %v331_v15 = vld [vmem:[#allocation2 + $0x67] sm:$0xff] }
 0x10b   :  { %1939 = vrot.lane.b32.xlu0 %v1938_v44, %s2090_s18  ;;  %1774 = vmatprep.mubr.msk.f32.mxu0 %vm268_vm2, %v2404_v53  ;;  %v330_v14 = vld [vmem:[#allocation2 + $0x5f] sm:$0xff]  ;;  %v1993_v16 = vpack.i.bf16 %v318_v12, %v346_v13  ;;  %v347_v19 = vld [vmem:[#allocation2 + $0x6e] sm:$0xff]  ;;  %v348_v25 = vld [vmem:[#allocation2 + $0x76] sm:$0xff] }
 0x10c   :  { %1775 = vmatmul.mubr.msk.f32.gmra.mrb[26].mxu0 %vm268_vm2, %v352_v55  ;;  %v1988_v17 = vpack.i.bf16 %v331_v15, %v330_v14  ;;  %v319_v18 = vld [vmem:[#allocation2 + $0x62] sm:$0xff]  ;;  %v336_v22 = vld [vmem:[#allocation2 + $0x71] sm:$0xff] }
 0x10d   :  { %v1998_v20 = vpack.i.bf16 %v319_v18, %v347_v19  ;;  %v308_v21 = vld [vmem:[#allocation2 + $0x69] sm:$0xff]  ;;  %v350_v26 = vld [vmem:[#allocation2 + $0x77] sm:$0xff] }
 0x10e   :  { %1954 = vrot.lane.b32.xlu1 %v1953_v50, %s2088_s2  ;;  %v332_v23 = vld [vmem:[#allocation2 + $0x6f] sm:$0xff] }
 0x10f   :  { %1944 = vrot.lane.b32.xlu0 %v1943_v51, %s2090_s18  ;;  %v320_v24 = vld [vmem:[#allocation2 + $0x6a] sm:$0xff] }
 0x110   :  { %v2003_v27 = vpack.i.bf16 %v320_v24, %v348_v25  ;;  %v286_v39 = vld [vmem:[#allocation2 + $0x8] sm:$0xff] }
 0x112   :  { %1964 = vrot.lane.b32.xlu1 %v1963_v60, %s2090_s18 }
 0x113   :  { %1959 = vrot.lane.b32.xlu0 %v1958_v61, %s2089_s17 }
 0x116   :  { %1974 = vrot.lane.b32.xlu1 %v1973_v3, %s2090_s18 }
 0x117   :  { %1969 = vrot.lane.b32.xlu0 %v1968_v4, %s2088_s2 }
 0x11a   :  { %1984 = vrot.lane.b32.xlu1 %v1983_v9, %s2090_s18 }
 0x11b   :  { %1979 = vrot.lane.b32.xlu0 %v1978_v10, %s2089_s17 }
 0x11e   :  { %1994 = vrot.lane.b32.xlu1 %v1993_v16, %s2090_s18 }
 0x11f   :  { %1989 = vrot.lane.b32.xlu0 %v1988_v17, %s2088_s2 }
 0x122   :  { %1999 = vrot.lane.b32.xlu1 %v1998_v20, %s2090_s18 }
 0x123   :  { %387 = vrot.lane.b32.xlu0 %v308_v21, %s2089_s17 }
 0x126   :  { %501 = vrot.lane.b32.xlu1 %v336_v22, %s2089_s17 }
 0x127   :  { %483 = vrot.lane.b32.xlu0 %v332_v23, %s2088_s2 }
 0x12a   :  { %557 = vrot.lane.b32.xlu1 %v350_v26, %s2088_s2 }
 0x12b   :  { %2004 = vrot.lane.b32.xlu0 %v2003_v27, %s2090_s18 }
 0x168   :  { %v1900_v28 = vpop.permute.xlu1 %1899 }
 0x169   :  { %v1890_v29 = vpop.permute.xlu0 %1889  ;;  %v1902_v36 = vunpack.i.h.bf16 %v1900_v28  ;;  %v1901_v43 = vunpack.i.l.bf16 %v1900_v28 }
 0x16a   :  { %v1892_v30 = vunpack.i.h.bf16 %v1890_v29  ;;  %v1891_v32 = vunpack.i.l.bf16 %v1890_v29 }
 0x16c   :  { %v1910_v33 = vpop.permute.xlu1 %1909  ;;  %v562_v45 = vsel %vm268_vm2, %v286_v39, %v1891_v32  ;;  %v561_v46 = vsel %vm268_vm2, %v285_v40, %v1892_v30 }
 0x16d   :  { %v1895_v35 = vpop.permute.xlu0 %1894  ;;  %v1911_v44 = vunpack.i.l.bf16 %v1910_v33  ;;  %v1912_v60 = vunpack.i.h.bf16 %v1910_v33 }
 0x16e   :  { %v1897_v1 = vunpack.i.h.bf16 %v1895_v35  ;;  %v1896_v37 = vunpack.i.l.bf16 %v1895_v35 }
 0x16f   :  { %v563_v61 = vsel %vm268_vm2, %v2339_v42, %v1911_v44  ;;  %v564_v9 = vsel %vm268_vm2, %v2345_v47, %v1912_v60  ;;  %v291_v60 = vld [vmem:[#allocation2 + $0x40] sm:$0xff] }
 0x170   :  { %v601_v48 = vsel %vm573_vm3, %v562_v45, %v1896_v37  ;;  %v574_v49 = vsel %vm573_vm3, %v561_v46, %v1897_v1  ;;  %v1915_v50 = vpop.permute.xlu1 %1914 }
 0x171   :  { %v1905_v51 = vpop.permute.xlu0 %1904  ;;  %v613_v52 = vsel %vm586_vm4, %v601_v48, %v1901_v43  ;;  %v587_v55 = vsel %vm586_vm4, %v574_v49, %v1902_v36  ;;  %v1916_v56 = vunpack.i.l.bf16 %v1915_v50  ;;  %v1917_v7 = vunpack.i.h.bf16 %v1915_v50 }
 0x172   :  { %v1907_v57 = vunpack.i.h.bf16 %v1905_v51  ;;  %v1906_v59 = vunpack.i.l.bf16 %v1905_v51  ;;  %768 = vmatprep.mubr.f32.mxu1 %v613_v52 }
 0x173   :  { %769 = vmatmul.mubr.f32.vlgmr.msra.gmra.mrb[0].mxu1 %v587_v55  ;;  %v292_v55 = vld [vmem:[#allocation2 + $0x48] sm:$0xff] }
 0x174   :  { %v602_v62 = vsel %vm573_vm3, %v563_v61, %v1906_v59  ;;  %v575_v63 = vsel %vm573_vm3, %v562_v45, %v1907_v57  ;;  %v1930_v0 = vpop.permute.xlu1 %1929 }
 0x175   :  { %v1920_v2 = vpop.permute.xlu0 %1919  ;;  %v614_v3 = vsel %vm586_vm4, %v602_v62, %v1916_v56  ;;  %v588_v4 = vsel %vm586_vm4, %v575_v63, %v1901_v43  ;;  %v1931_v8 = vunpack.i.l.bf16 %v1930_v0  ;;  %v1932_v19 = vunpack.i.h.bf16 %v1930_v0 }
 0x176   :  { %v1922_v5 = vunpack.i.h.bf16 %v1920_v2  ;;  %v1921_v6 = vunpack.i.l.bf16 %v1920_v2  ;;  %773 = vmatprep.mubr.f32.mxu1 %v614_v3 }
 0x177   :  { %774 = vmatmul.mubr.f32.gmra.mrb[2].mxu1 %v588_v4  ;;  %v565_v20 = vsel %vm268_vm2, %v2355_v58, %v1931_v8  ;;  %v566_v30 = vsel %vm268_vm2, %v2351_v54, %v1932_v19 }
 0x178   :  { %v603_v42 = vsel %vm573_vm3, %v564_v9, %v1921_v6  ;;  %v576_v10 = vsel %vm573_vm3, %v563_v61, %v1922_v5  ;;  %v1935_v12 = vpop.permute.xlu1 %1934 }
 0x179   :  { %v1925_v13 = vpop.permute.xlu0 %1924  ;;  %v615_v14 = vsel %vm586_vm4, %v603_v42, %v1917_v7  ;;  %v589_v15 = vsel %vm586_vm4, %v576_v10, %v1916_v56  ;;  %v1936_v16 = vunpack.i.l.bf16 %v1935_v12  ;;  %v1937_v28 = vunpack.i.h.bf16 %v1935_v12 }
 0x17a   :  { %v1927_v17 = vunpack.i.h.bf16 %v1925_v13  ;;  %v1926_v18 = vunpack.i.l.bf16 %v1925_v13  ;;  %778 = vmatprep.mubr.f32.mxu1 %v615_v14 }
 0x17b   :  { %779 = vmatmul.mubr.f32.gmra.mrb[4].mxu1 %v589_v15 }
 0x17c   :  { %v604_v47 = vsel %vm573_vm3, %v565_v20, %v1926_v18  ;;  %v577_v21 = vsel %vm573_vm3, %v564_v9, %v1927_v17  ;;  %v1950_v22 = vpop.permute.xlu1 %1949 }
 0x17d   :  { %v1940_v23 = vpop.permute.xlu0 %1939  ;;  %v616_v24 = vsel %vm586_vm4, %v604_v47, %v1936_v16  ;;  %v590_v25 = vsel %vm586_vm4, %v577_v21, %v1917_v7  ;;  %v1951_v29 = vunpack.i.l.bf16 %v1950_v22  ;;  %v1952_v43 = vunpack.i.h.bf16 %v1950_v22 }
 0x17e   :  { %v1942_v26 = vunpack.i.h.bf16 %v1940_v23  ;;  %v1941_v27 = vunpack.i.l.bf16 %v1940_v23  ;;  %783 = vmatprep.mubr.f32.mxu1 %v616_v24 }
 0x17f   :  { %784 = vmatmul.mubr.f32.gmra.mrb[6].mxu1 %v590_v25  ;;  %v599_v44 = vsel %vm268_vm2, %v2367_v11, %v1951_v29  ;;  %v568_v11 = vsel %vm268_vm2, %v292_v55, %v1952_v43 }
 0x180   :  { %v605_v58 = vsel %vm573_vm3, %v566_v30, %v1941_v27  ;;  %v578_v32 = vsel %vm573_vm3, %v565_v20, %v1942_v26  ;;  %v1955_v33 = vpop.permute.xlu1 %1954 }
 0x181   :  { %v1945_v35 = vpop.permute.xlu0 %1944  ;;  %v617_v36 = vsel %vm586_vm4, %v605_v58, %v1937_v28  ;;  %v591_v1 = vsel %vm586_vm4, %v578_v32, %v1936_v16  ;;  %v1956_v37 = vunpack.i.l.bf16 %v1955_v33  ;;  %v1957_v56 = vunpack.i.h.bf16 %v1955_v33 }
 0x182   :  { %v1947_v39 = vunpack.i.h.bf16 %v1945_v35  ;;  %v1946_v40 = vunpack.i.l.bf16 %v1945_v35  ;;  %788 = vmatprep.mubr.f32.mxu1 %v617_v36 }
 0x183   :  { %789 = vmatmul.mubr.f32.gmra.mrb[8].mxu1 %v591_v1 }
 0x184   :  { %v606_v54 = vsel %vm573_vm3, %v599_v44, %v1946_v40  ;;  %v579_v45 = vsel %vm573_vm3, %v566_v30, %v1947_v39  ;;  %v1965_v46 = vpop.permute.xlu1 %1964 }
 0x185   :  { %v1960_v48 = vpop.permute.xlu0 %1959  ;;  %v618_v49 = vsel %vm586_vm4, %v606_v54, %v1956_v37  ;;  %v592_v50 = vsel %vm586_vm4, %v579_v45, %v1937_v28  ;;  %v1966_v51 = vunpack.i.l.bf16 %v1965_v46  ;;  %v1967_v57 = vunpack.i.h.bf16 %v1965_v46 }
 0x186   :  { %v1961_v52 = vunpack.i.l.bf16 %v1960_v48  ;;  %793 = vmatprep.mubr.f32.mxu1 %v618_v49  ;;  %v1962_v59 = vunpack.i.h.bf16 %v1960_v48 }
 0x187   :  { %794 = vmatmul.mubr.f32.gmra.mrb[10].mxu1 %v592_v50  ;;  %v607_v61 = vsel %vm573_vm3, %v568_v11, %v1966_v51 }
 0x188   :  { %v567_v62 = vsel %vm268_vm2, %v291_v60, %v1961_v52  ;;  %v1975_v63 = vpop.permute.xlu1 %1974  ;;  %v619_v2 = vsel %vm586_vm4, %v607_v61, %v1957_v56  ;;  %v569_v8 = vsel %vm268_vm2, %v2384_v34, %v1962_v59 }
 0x189   :  { %v1970_v0 = vpop.permute.xlu0 %1969  ;;  %v1977_v3 = vunpack.i.h.bf16 %v1975_v63  ;;  %v1976_v4 = vunpack.i.l.bf16 %v1975_v63  ;;  %798 = vmatprep.mubr.f32.mxu1 %v619_v2  ;;  %v580_v7 = vsel %vm573_vm3, %v567_v62, %v1967_v57  ;;  %v1244_v63 = vld [vmem:[%s2811_s3 + $0x100] sm:$0xff] }
 0x18a   :  { %v1972_v5 = vunpack.i.h.bf16 %v1970_v0  ;;  %v1971_v6 = vunpack.i.l.bf16 %v1970_v0  ;;  %v1245_v0 = vld [vmem:[%s2811_s3 + $0x108] sm:$0xff] }
 0x18b   :  { %v608_v42 = vsel %vm573_vm3, %v569_v8, %v1976_v4  ;;  %v581_v14 = vsel %vm573_vm3, %v568_v11, %v1977_v3  ;;  %v1877_v2 = vpack.c.bf16 %v1245_v0, %v1244_v63 }
 0x18c   :  { %v593_v9 = vsel %vm586_vm4, %v580_v7, %v1971_v6  ;;  %v1985_v10 = vpop.permute.xlu1 %1984  ;;  %v620_v13 = vsel %vm586_vm4, %v608_v42, %v1972_v5  ;;  %v594_v19 = vsel %vm586_vm4, %v581_v14, %v1957_v56  ;;  %v1247_v6 = vld [vmem:[%s2811_s3 + $0x118] sm:$0xff]  ;;  %v1228_v42 = vld [vmem:[%s2811_s3 + $0x80] sm:$0xff]  ;;  %v1213_v14 = vld [vmem:[%s2811_s3 + $0x8] sm:$0xff] }
 0x18d   :  { %v1980_v12 = vpop.permute.xlu0 %1979  ;;  %799 = vmatmul.mubr.f32.gmra.mrb[12].mxu1 %v593_v9  ;;  %v1987_v15 = vunpack.i.h.bf16 %v1985_v10  ;;  %v1986_v17 = vunpack.i.l.bf16 %v1985_v10  ;;  %1878 = vmatprep.subr.bf16.mxu1 %v1877_v2  ;;  %v1229_v10 = vld [vmem:[%s2811_s3 + $0x88] sm:$0xff] }
 0x18e   :  { %v1981_v16 = vunpack.i.l.bf16 %v1980_v12  ;;  %803 = vmatprep.mubr.f32.mxu1 %v620_v13  ;;  %v1982_v18 = vunpack.i.h.bf16 %v1980_v12  ;;  %1880 = vmatpush3.bf16.msra.mxu1 %v1877_v2  ;;  %v1212_v12 = vld [vmem:[%s2811_s3] sm:$0xff]  ;;  %v1845_v13 = vpack.c.bf16 %v1229_v10, %v1228_v42 }
 0x18f   :  { %v582_v21 = vsel %vm573_vm3, %v569_v8, %v1987_v15  ;;  %v1230_v15 = vld [vmem:[%s2811_s3 + $0x90] sm:$0xff] }
 0x190   :  { %v570_v34 = vsel %vm268_vm2, %v2382_v31, %v1981_v16  ;;  %v1995_v20 = vpop.permute.xlu1 %1994  ;;  %v571_v27 = vsel %vm268_vm2, %v2396_v41, %v1982_v18  ;;  %v595_v58 = vsel %vm586_vm4, %v582_v21, %v1972_v5  ;;  %v1246_v5 = vld [vmem:[%s2811_s3 + $0x110] sm:$0xff]  ;;  %v1231_v16 = vld [vmem:[%s2811_s3 + $0x98] sm:$0xff]  ;;  %1846 = vmatprep.subr.bf16.mxu0 %v1845_v13 }
 0x191   :  { %v1990_v47 = vpop.permute.xlu0 %1989  ;;  %804 = vmatmul.mubr.f32.gmra.mrb[14].mxu1 %v594_v19  ;;  %v1997_v22 = vunpack.i.h.bf16 %v1995_v20  ;;  %v1996_v23 = vunpack.i.l.bf16 %v1995_v20  ;;  %v609_v26 = vsel %vm573_vm3, %v570_v34, %v1986_v17  ;;  %v1881_v7 = vpack.c.bf16 %v1247_v6, %v1246_v5  ;;  %v1214_v19 = vld [vmem:[%s2811_s3 + $0x10] sm:$0xff]  ;;  %v1232_v20 = vld [vmem:[%s2811_s3 + $0xa0] sm:$0xff] }
 0x192   :  { %v1992_v24 = vunpack.i.h.bf16 %v1990_v47  ;;  %v1991_v25 = vunpack.i.l.bf16 %v1990_v47  ;;  %v1847_v17 = vpack.c.bf16 %v1213_v14, %v1212_v12  ;;  %v1849_v18 = vpack.c.bf16 %v1231_v16, %v1230_v15  ;;  %v1233_v47 = vld [vmem:[%s2811_s3 + $0xa8] sm:$0xff]  ;;  %v1240_v14 = vld [vmem:[%s2811_s3 + $0xe0] sm:$0xff] }
 0x193   :  { %v610_v29 = vsel %vm573_vm3, %v571_v27, %v1996_v23  ;;  %v583_v1 = vsel %vm573_vm3, %v570_v34, %v1997_v22  ;;  %1882 = vmatprep.subr.bf16.mxu1 %v1881_v7  ;;  %v1215_v34 = vld [vmem:[%s2811_s3 + $0x18] sm:$0xff]  ;;  %v1853_v22 = vpack.c.bf16 %v1233_v47, %v1232_v20  ;;  %v1216_v23 = vld [vmem:[%s2811_s3 + $0x20] sm:$0xff]  ;;  %v1241_v15 = vld [vmem:[%s2811_s3 + $0xe8] sm:$0xff] }
 0x194   :  { %v621_v28 = vsel %vm586_vm4, %v609_v26, %v1991_v25  ;;  %v2000_v30 = vpop.permute.xlu1 %1999  ;;  %v622_v32 = vsel %vm586_vm4, %v610_v29, %v1992_v24  ;;  %v596_v39 = vsel %vm586_vm4, %v583_v1, %v1991_v25  ;;  %1884 = vmatpush3.bf16.msra.mxu1 %v1881_v7  ;;  %1848 = vmatpush3.bf16.msra.mxu0 %v1847_v17  ;;  %v1234_v25 = vld [vmem:[%s2811_s3 + $0xb0] sm:$0xff]  ;;  %v1235_v26 = vld [vmem:[%s2811_s3 + $0xb8] sm:$0xff]  ;;  %v1224_v16 = vld [vmem:[%s2811_s3 + $0x60] sm:$0xff] }
 0x195   :  { %v388_v31 = vpop.permute.xlu0 %387  ;;  %808 = vmatprep.mubr.f32.mxu1 %v621_v28  ;;  %v2002_v33 = vunpack.i.h.bf16 %v2000_v30  ;;  %v2001_v35 = vunpack.i.l.bf16 %v2000_v30  ;;  %v1851_v21 = vpack.c.bf16 %v1215_v34, %v1214_v19  ;;  %1850 = vmatprep.subr.bf16.mxu0 %v1849_v18  ;;  %v1857_v28 = vpack.c.bf16 %v1235_v26, %v1234_v25  ;;  %v1218_v29 = vld [vmem:[%s2811_s3 + $0x30] sm:$0xff]  ;;  %v1219_v30 = vld [vmem:[%s2811_s3 + $0x38] sm:$0xff]  ;;  %v1225_v17 = vld [vmem:[%s2811_s3 + $0x68] sm:$0xff] }
 0x196   :  { %v572_v36 = vsel %vm268_vm2, %v2394_v38, %v388_v31  ;;  %809 = vmatmul.mubr.f32.gmra.mrb[16].mxu1 %v595_v58  ;;  %v1236_v31 = vld [vmem:[%s2811_s3 + $0xc0] sm:$0xff]  ;;  %v1237_v58 = vld [vmem:[%s2811_s3 + $0xc8] sm:$0xff]  ;;  %v1238_v1 = vld [vmem:[%s2811_s3 + $0xd0] sm:$0xff]  ;;  %v1871_v34 = vpack.c.bf16 %v1225_v17, %v1224_v16 }
 0x197   :  { %813 = vmatprep.mubr.f32.mxu1 %v622_v32  ;;  %v611_v41 = vsel %vm573_vm3, %v572_v36, %v2001_v35  ;;  %v584_v44 = vsel %vm573_vm3, %v571_v27, %v2002_v33  ;;  %v1859_v32 = vpack.c.bf16 %v1219_v30, %v1218_v29  ;;  %v1861_v33 = vpack.c.bf16 %v1237_v58, %v1236_v31  ;;  %v1220_v35 = vld [vmem:[%s2811_s3 + $0x40] sm:$0xff]  ;;  %v1226_v25 = vld [vmem:[%s2811_s3 + $0x70] sm:$0xff]  ;;  %v1227_v26 = vld [vmem:[%s2811_s3 + $0x78] sm:$0xff] }
 0x198   :  { %v502_v40 = vpop.permute.xlu1 %501  ;;  %v597_v45 = vsel %vm586_vm4, %v584_v44, %v1992_v24  ;;  %v1217_v24 = vld [vmem:[%s2811_s3 + $0x28] sm:$0xff]  ;;  %1852 = vmatpush3.bf16.msra.mxu0 %v1851_v21  ;;  %v1875_v29 = vpack.c.bf16 %v1227_v26, %v1226_v25 }
 0x199   :  { %v484_v37 = vpop.permute.xlu0 %483  ;;  %v600_v48 = vsel %vm268_vm2, %v2404_v53, %v502_v40  ;;  %v1855_v27 = vpack.c.bf16 %v1217_v24, %v1216_v23  ;;  %1854 = vmatprep.subr.bf16.mxu0 %v1853_v22  ;;  %v1222_v40 = vld [vmem:[%s2811_s3 + $0x50] sm:$0xff]  ;;  %v1243_v23 = vld [vmem:[%s2811_s3 + $0xf8] sm:$0xff] }
 0x19a   :  { %814 = vmatmul.mubr.f32.gmra.mrb[18].mxu1 %v596_v39  ;;  %v623_v43 = vsel %vm586_vm4, %v611_v41, %v484_v37  ;;  %v1239_v41 = vld [vmem:[%s2811_s3 + $0xd8] sm:$0xff]  ;;  %v1242_v22 = vld [vmem:[%s2811_s3 + $0xf0] sm:$0xff] }
 0x19b   :  { %818 = vmatprep.mubr.f32.mxu1 %v623_v43  ;;  %v1865_v39 = vpack.c.bf16 %v1239_v41, %v1238_v1  ;;  %v1223_v43 = vld [vmem:[%s2811_s3 + $0x58] sm:$0xff]  ;;  %v1873_v24 = vpack.c.bf16 %v1243_v23, %v1242_v22 }
 0x19c   :  { %v558_v49 = vpop.permute.xlu1 %557  ;;  %1856 = vmatpush3.bf16.msra.mxu0 %v1855_v27  ;;  %v1867_v44 = vpack.c.bf16 %v1223_v43, %v1222_v40 }
 0x19d   :  { %v2005_v54 = vpop.permute.xlu0 %2004  ;;  %1858 = vmatprep.subr.bf16.mxu0 %v1857_v28 }
 0x19e   :  { %v2007_v38 = vunpack.i.h.bf16 %v2005_v54  ;;  %v2006_v46 = vunpack.i.l.bf16 %v2005_v54  ;;  %819 = vmatmul.mubr.f32.gmra.mrb[20].mxu1 %v597_v45  ;;  %v2608_v45 = vld [vmem:[%s2812_s5] ss:$0 sm:$0xff] }
 0x1a0   :  { %v612_v50 = vsel %vm573_vm3, %v600_v48, %v2006_v46  ;;  %v585_v51 = vsel %vm573_vm3, %v572_v36, %v2007_v38  ;;  %v1221_v36 = vld [vmem:[%s2811_s3 + $0x48] sm:$0xff]  ;;  %1860 = vmatpush3.bf16.msra.mxu0 %v1859_v32 }
 0x1a1   :  { %v624_v52 = vsel %vm586_vm4, %v612_v50, %v558_v49  ;;  %v598_v55 = vsel %vm586_vm4, %v585_v51, %v484_v37  ;;  %v1863_v37 = vpack.c.bf16 %v1221_v36, %v1220_v35  ;;  %1862 = vmatprep.subr.bf16.mxu0 %v1861_v33 }
 0x1a2   :  { %823 = vmatprep.mubr.f32.mxu1 %v624_v52 }
 0x1a3   :  { %824 = vmatmul.mubr.f32.gmra.mrb[22].mxu1 %v598_v55 }
 0x1a4   :  { %1864 = vmatpush3.bf16.msra.mxu0 %v1863_v37 }
 0x1a5   :  { %1866 = vmatprep.subr.bf16.mxu0 %v1865_v39 }
 0x1a8   :  { %1868 = vmatpush3.bf16.msra.mxu0 %v1867_v44 }
 0x1c7   :  { %v2497_v56 = vpop.f32.mrb[16].mxu0 }
 0x1c8   :  { %v2499_v57 = vpop.f32.mrb[17].mxu0 }
 0x1cb   :  { %v2501_v59 = vpop.f32.mrb[18].mxu0 }
 0x1cc   :  { %v2503_v11 = vpop.f32.mrb[19].mxu0 }
 0x1cf   :  { %v2505_v53 = vpop.f32.mrb[20].mxu0 }
 0x1d0   :  { %v2507_v60 = vpop.f32.mrb[21].mxu0 }
 0x1d7   :  { %v2509_v61 = vpop.f32.mrb[22].mxu0 }
 0x1d8   :  { %v2511_v62 = vpop.f32.mrb[23].mxu0 }
 0x1db   :  { %v2519_v3 = vpop.f32.mrb[24].mxu0 }
 0x1dc   :  { %v2521_v4 = vpop.f32.mrb[25].mxu0 }
 0x1df   :  { %v2529_v8 = vpop.f32.mrb[26].mxu0 }
 0x1e0   :  { %v2531_v9 = vpop.f32.mrb[27].mxu0 }
 0x246   :  { %v1597_v54 = vpop.f32.mrb[0].mxu1 }
 0x247   :  { %v1598_v38 = vpop.f32.mrb[1].mxu1 }
 0x248   :  { %v1599_v46 = vadd.f32 %v1598_v38, %v1597_v54 }
 0x24a   :  { %v771_v48 = vadd.f32 %v1599_v46, %v2608_v45  ;;  %v1600_v49 = vpop.f32.mrb[2].mxu1 }
 0x24b   :  { %v1601_v50 = vpop.f32.mrb[3].mxu1 }
 0x24c   :  { %v896_v51 = vadd.f32 %v2499_v57, %v771_v48  ;;  %v1602_v52 = vadd.f32 %v1601_v50, %v1600_v49 }
 0x24e   :  { %v954_v55 = vmax.f32 %v896_v51, 0.0  ;;  %v776_v63 = vadd.f32 %v1602_v52, %v2608_v45  ;;  %v1603_v0 = vpop.f32.mrb[4].mxu1 }
 0x24f   :  { %v1604_v2 = vpop.f32.mrb[5].mxu1 }
 0x250   :  { %966 = vst.msk [vmem:[#allocation3] sm:$0xff] %vm268_vm2, %v954_v55  ;;  %v901_v5 = vadd.f32 %v2497_v56, %v776_v63  ;;  %v1605_v6 = vadd.f32 %v1604_v2, %v1603_v0  ;;  %v1869_v56 = vpack.c.bf16 %v1241_v15, %v1240_v14 }
 0x252   :  { %v955_v7 = vmax.f32 %v901_v5, 0.0  ;;  %v781_v42 = vadd.f32 %v1605_v6, %v2608_v45  ;;  %v1606_v10 = vpop.f32.mrb[6].mxu1  ;;  %1870 = vmatprep.subr.bf16.mxu0 %v1869_v56 }
 0x253   :  { %v1607_v12 = vpop.f32.mrb[7].mxu1  ;;  %1872 = vmatpush3.bf16.msra.mxu0 %v1871_v34 }
 0x254   :  { %967 = vst.msk [vmem:[#allocation3 + $0x8] sm:$0xff] %vm268_vm2, %v955_v7  ;;  %v906_v57 = vadd.f32 %v2503_v11, %v781_v42  ;;  %v1608_v13 = vadd.f32 %v1607_v12, %v1606_v10  ;;  %1874 = vmatprep.subr.bf16.mxu0 %v1873_v24 }
 0x256   :  { %v956_v18 = vmax.f32 %v906_v57, 0.0  ;;  %v786_v11 = vadd.f32 %v1608_v13, %v2608_v45  ;;  %v1609_v19 = vpop.f32.mrb[8].mxu1 }
 0x257   :  { %v1610_v20 = vpop.f32.mrb[9].mxu1  ;;  %1876 = vmatpush3.bf16.msra.mxu0 %v1875_v29 }
 0x258   :  { %968 = vst.msk [vmem:[#allocation3 + $0x10] sm:$0xff] %vm268_vm2, %v956_v18  ;;  %v911_v47 = vadd.f32 %v2501_v59, %v786_v11  ;;  %v1611_v21 = vadd.f32 %v1610_v20, %v1609_v19 }
 0x25a   :  { %v957_v59 = vmax.f32 %v911_v47, 0.0  ;;  %v791_v27 = vadd.f32 %v1611_v21, %v2608_v45  ;;  %v1612_v28 = vpop.f32.mrb[10].mxu1 }
 0x25b   :  { %v1613_v30 = vpop.f32.mrb[11].mxu1  ;;  %v994_v35 = vld [vmem:[#allocation3 + $0x2] sm:$0xff] }
 0x25c   :  { %969 = vst.msk [vmem:[#allocation3 + $0x18] sm:$0xff] %vm268_vm2, %v957_v59  ;;  %v916_v31 = vadd.f32 %v2507_v60, %v791_v27  ;;  %v1614_v58 = vadd.f32 %v1613_v30, %v1612_v28  ;;  %v986_v36 = vld [vmem:[#allocation3 + $0x1] sm:$0xff] }
 0x25d   :  { %v1002_v49 = vld [vmem:[#allocation3 + $0x7] sm:$0xff] }
 0x25e   :  { %v958_v32 = vmax.f32 %v916_v31, 0.0  ;;  %v796_v33 = vadd.f32 %v1614_v58, %v2608_v45 }
 0x25f   :  { %v2649_v1 = vld [vmem:[#allocation3 + $0x10] sm:$0xff] }
 0x260   :  { %v1014_v41 = vld [vmem:[#allocation3 + $0xe] sm:$0xff]  ;;  %970 = vst.msk [vmem:[#allocation3 + $0x20] sm:$0xff] %vm268_vm2, %v958_v32  ;;  %v921_v39 = vadd.f32 %v2505_v53, %v796_v33  ;;  %v1615_v40 = vpop.f32.mrb[12].mxu1  ;;  %1785 = vmatprep.mubr.msk.f32.mxu1 %vm268_vm2, %v2649_v1 }
 0x261   :  { %v987_v37 = vld [vmem:[#allocation3 + $0x9] sm:$0xff]  ;;  %v2013_v60 = vpack.i.bf16 %v994_v35, %v1014_v41  ;;  %v1616_v44 = vpop.f32.mrb[13].mxu1 }
 0x262   :  { %v2008_v43 = vpack.i.bf16 %v986_v36, %v987_v37  ;;  %v1003_v54 = vld [vmem:[#allocation3 + $0xf] sm:$0xff]  ;;  %v959_v38 = vmax.f32 %v921_v39, 0.0  ;;  %v1617_v46 = vadd.f32 %v1616_v44, %v1615_v40 }
 0x263   :  { %2014 = vrot.lane.b32.xlu1 %v2013_v60, %s2090_s18  ;;  %v2657_v48 = vld [vmem:[#allocation3 + $0x18] sm:$0xff]  ;;  %v2018_v51 = vpack.i.bf16 %v1002_v49, %v1003_v54  ;;  %v995_v2 = vld [vmem:[#allocation3 + $0xa] sm:$0xff] }
 0x264   :  { %2009 = vrot.lane.b32.xlu0 %v2008_v43, %s2089_s17  ;;  %971 = vst.msk [vmem:[#allocation3 + $0x28] sm:$0xff] %vm268_vm2, %v959_v38  ;;  %v801_v53 = vadd.f32 %v1617_v46, %v2608_v45  ;;  %v1618_v50 = vpop.f32.mrb[14].mxu1  ;;  %1786 = vmatmul.mubr.msk.f32.vlgmr.msra.gmra.mrb[24].mxu1 %vm268_vm2, %v2657_v48  ;;  %v1015_v55 = vld [vmem:[#allocation3 + $0x16] sm:$0xff] }
 0x265   :  { %v1619_v52 = vpop.f32.mrb[15].mxu1  ;;  %v988_v6 = vld [vmem:[#allocation3 + $0x11] sm:$0xff]  ;;  %v2023_v57 = vpack.i.bf16 %v995_v2, %v1015_v55 }
 0x266   :  { %v926_v63 = vadd.f32 %v2511_v62, %v801_v53  ;;  %v1620_v0 = vadd.f32 %v1619_v52, %v1618_v50  ;;  %v1004_v18 = vld [vmem:[#allocation3 + $0x17] sm:$0xff] }
 0x267   :  { %v2665_v5 = vld [vmem:[#allocation3 + $0x20] sm:$0xff]  ;;  %v996_v11 = vld [vmem:[#allocation3 + $0x12] sm:$0xff] }
 0x268   :  { %2019 = vrot.lane.b32.xlu0 %v2018_v51, %s2088_s2  ;;  %v989_v7 = vld [vmem:[#allocation3 + $0x19] sm:$0xff]  ;;  %v960_v42 = vmax.f32 %v926_v63, 0.0  ;;  %v806_v10 = vadd.f32 %v1620_v0, %v2608_v45  ;;  %1788 = vmatprep.mubr.msk.f32.mxu1 %vm268_vm2, %v2665_v5 }
 0x269   :  { %v2028_v12 = vpack.i.bf16 %v989_v7, %v988_v6  ;;  %v1621_v13 = vpop.f32.mrb[16].mxu1  ;;  %v1005_v14 = vld [vmem:[#allocation3 + $0x1f] sm:$0xff] }
 0x26a   :  { %v1016_v15 = vld [vmem:[#allocation3 + $0x1e] sm:$0xff]  ;;  %972 = vst.msk [vmem:[#allocation3 + $0x30] sm:$0xff] %vm268_vm2, %v960_v42  ;;  %v931_v62 = vadd.f32 %v2509_v61, %v806_v10  ;;  %v1622_v56 = vpop.f32.mrb[17].mxu1  ;;  %v2033_v34 = vpack.i.bf16 %v1005_v14, %v1004_v18 }
 0x26b   :  { %2029 = vrot.lane.b32.xlu1 %v2028_v12, %s2089_s17  ;;  %v1623_v16 = vadd.f32 %v1622_v56, %v1621_v13  ;;  %v1024_v17 = vld [vmem:[#allocation3 + $0x28] sm:$0xff]  ;;  %v2038_v20 = vpack.i.bf16 %v996_v11, %v1016_v15  ;;  %v997_v25 = vld [vmem:[#allocation3 + $0x1a] sm:$0xff] }
 0x26c   :  { %2024 = vrot.lane.b32.xlu0 %v2023_v57, %s2090_s18  ;;  %v961_v19 = vmax.f32 %v931_v62, 0.0  ;;  %1789 = vmatmul.mubr.msk.f32.gmra.mrb[26].mxu1 %vm268_vm2, %v1024_v17  ;;  %v1017_v22 = vld [vmem:[#allocation3 + $0x26] sm:$0xff] }
 0x26d   :  { %v811_v47 = vadd.f32 %v1623_v16, %v2608_v45  ;;  %v1624_v21 = vpop.f32.mrb[18].mxu1  ;;  %v2043_v26 = vpack.i.bf16 %v997_v25, %v1017_v22  ;;  %v1012_v60 = vld [vmem:[#allocation3 + $0x21] sm:$0xff] }
 0x26e   :  { %973 = vst.msk [vmem:[#allocation3 + $0x38] sm:$0xff] %vm268_vm2, %v961_v19  ;;  %v1625_v61 = vpop.f32.mrb[19].mxu1  ;;  %v979_v22 = vld [vmem:[#allocation3 + $0x8] sm:$0xff] }
 0x26f   :  { %2034 = vrot.lane.b32.xlu1 %v2033_v34, %s2088_s2  ;;  %v936_v23 = vadd.f32 %v2521_v4, %v811_v47  ;;  %v1626_v24 = vadd.f32 %v1625_v61, %v1624_v21  ;;  %v978_v21 = vld [vmem:[#allocation3] sm:$0xff] }
 0x270   :  { %2039 = vrot.lane.b32.xlu0 %v2038_v20, %s2090_s18 }
 0x271   :  { %v962_v59 = vmax.f32 %v936_v23, 0.0  ;;  %v816_v27 = vadd.f32 %v1626_v24, %v2608_v45  ;;  %v1627_v28 = vpop.f32.mrb[20].mxu1 }
 0x272   :  { %v1628_v29 = vpop.f32.mrb[21].mxu1 }
 0x273   :  { %974 = vst.msk [vmem:[#allocation3 + $0x40] sm:$0xff] %vm268_vm2, %v962_v59  ;;  %v941_v30 = vadd.f32 %v2519_v3, %v816_v27  ;;  %v1629_v31 = vadd.f32 %v1628_v29, %v1627_v28 }
 0x274   :  { %2044 = vrot.lane.b32.xlu0 %v2043_v26, %s2090_s18 }
 0x275   :  { %v963_v58 = vmax.f32 %v941_v30, 0.0  ;;  %v821_v32 = vadd.f32 %v1629_v31, %v2608_v45  ;;  %v998_v52 = vld [vmem:[#allocation3 + $0x32] sm:$0xff] }
 0x276   :  { %v1630_v33 = vpop.f32.mrb[22].mxu1  ;;  %v1006_v55 = vld [vmem:[#allocation3 + $0x37] sm:$0xff] }
 0x277   :  { %975 = vst.msk [vmem:[#allocation3 + $0x48] sm:$0xff] %vm268_vm2, %v963_v58  ;;  %v946_v4 = vadd.f32 %v2531_v9, %v821_v32  ;;  %v1631_v35 = vpop.f32.mrb[23].mxu1  ;;  %v1022_v9 = vld [vmem:[#allocation3 + $0x27] sm:$0xff] }
 0x278   :  { %v1632_v36 = vadd.f32 %v1631_v35, %v1630_v33 }
 0x279   :  { %v964_v41 = vmax.f32 %v946_v4, 0.0 }
 0x27a   :  { %v826_v37 = vadd.f32 %v1632_v36, %v2608_v45  ;;  %v2688_v39 = vld [vmem:[#allocation3 + $0x40] sm:$0xff]  ;;  %v990_v45 = vld [vmem:[#allocation3 + $0x31] sm:$0xff] }
 0x27b   :  { %v991_v40 = vld [vmem:[#allocation3 + $0x39] sm:$0xff]  ;;  %976 = vst.msk [vmem:[#allocation3 + $0x50] sm:$0xff] %vm268_vm2, %v964_v41  ;;  %1791 = vmatprep.mubr.msk.f32.mxu1 %vm268_vm2, %v2688_v39 }
 0x27c   :  { %v2048_v3 = vpack.i.bf16 %v991_v40, %v1012_v60  ;;  %v951_v43 = vadd.f32 %v2529_v8, %v826_v37  ;;  %v1007_v44 = vld [vmem:[#allocation3 + $0x3f] sm:$0xff] }
 0x27d   :  { %v2053_v49 = vpack.i.bf16 %v1007_v44, %v1022_v9  ;;  %v1018_v50 = vld [vmem:[#allocation3 + $0x3e] sm:$0xff] }
 0x27e   :  { %2049 = vrot.lane.b32.xlu1 %v2048_v3, %s2089_s17  ;;  %v965_v54 = vmax.f32 %v951_v43, 0.0  ;;  %v2695_v38 = vld [vmem:[#allocation3 + $0x48] sm:$0xff]  ;;  %v2058_v63 = vpack.i.bf16 %v998_v52, %v1018_v50  ;;  %v999_v6 = vld [vmem:[#allocation3 + $0x3a] sm:$0xff] }
 0x27f   :  { %v992_v46 = vld [vmem:[#allocation3 + $0x41] sm:$0xff]  ;;  %1792 = vmatmul.mubr.msk.f32.gmra.mrb[28].mxu1 %vm268_vm2, %v2695_v38 }
 0x280   :  { %v2063_v53 = vpack.i.bf16 %v992_v46, %v990_v45  ;;  %977 = vst.msk [vmem:[#allocation3 + $0x58] sm:$0xff] %vm268_vm2, %v965_v54  ;;  %v1008_v51 = vld [vmem:[#allocation3 + $0x47] sm:$0xff] }
 0x281   :  { %v2068_v0 = vpack.i.bf16 %v1008_v51, %v1006_v55  ;;  %v1019_v2 = vld [vmem:[#allocation3 + $0x46] sm:$0xff] }
 0x282   :  { %2054 = vrot.lane.b32.xlu1 %v2053_v49, %s2088_s2  ;;  %2064 = vrot.lane.b32.xlu0 %v2063_v53, %s2089_s17  ;;  %v2702_v8 = vld [vmem:[#allocation3 + $0x50] sm:$0xff]  ;;  %v2073_v42 = vpack.i.bf16 %v999_v6, %v1019_v2  ;;  %v1000_v57 = vld [vmem:[#allocation3 + $0x42] sm:$0xff] }
 0x283   :  { %1794 = vmatprep.mubr.msk.f32.mxu1 %vm268_vm2, %v2702_v8  ;;  %v993_v10 = vld [vmem:[#allocation3 + $0x49] sm:$0xff] }
 0x284   :  { %v1020_v12 = vld [vmem:[#allocation3 + $0x4e] sm:$0xff] }
 0x285   :  { %v2078_v13 = vpack.i.bf16 %v1000_v57, %v1020_v12  ;;  %v1009_v14 = vld [vmem:[#allocation3 + $0x4f] sm:$0xff] }
 0x286   :  { %2059 = vrot.lane.b32.xlu1 %v2058_v63, %s2090_s18  ;;  %2069 = vrot.lane.b32.xlu0 %v2068_v0, %s2088_s2  ;;  %v1001_v62 = vld [vmem:[#allocation3 + $0x4a] sm:$0xff] }
 0x287   :  { %v1025_v7 = vld [vmem:[#allocation3 + $0x58] sm:$0xff] }
 0x288   :  { %1795 = vmatmul.mubr.msk.f32.gmra.mrb[30].mxu1 %vm268_vm2, %v1025_v7  ;;  %v1021_v15 = vld [vmem:[#allocation3 + $0x56] sm:$0xff] }
 0x289   :  { %v2083_v56 = vpack.i.bf16 %v1001_v62, %v1021_v15  ;;  %v1013_v16 = vld [vmem:[#allocation3 + $0x51] sm:$0xff] }
 0x28a   :  { %2074 = vrot.lane.b32.xlu1 %v2073_v42, %s2090_s18  ;;  %1048 = vrot.lane.b32.xlu0 %v993_v10, %s2089_s17  ;;  %v1023_v17 = vld [vmem:[#allocation3 + $0x57] sm:$0xff] }
 0x28e   :  { %2079 = vrot.lane.b32.xlu1 %v2078_v13, %s2090_s18  ;;  %1112 = vrot.lane.b32.xlu0 %v1009_v14, %s2088_s2 }
 0x292   :  { %1126 = vrot.lane.b32.xlu1 %v1013_v16, %s2089_s17  ;;  %2084 = vrot.lane.b32.xlu0 %v2083_v56, %s2090_s18  ;;  %v983_v16 = vld [vmem:[#allocation3 + $0x38] sm:$0xff] }
 0x296   :  { %1166 = vrot.lane.b32.xlu1 %v1023_v17, %s2088_s2  ;;  %v982_v17 = vld [vmem:[#allocation3 + $0x30] sm:$0xff] }
 0x2d5   :  { %v2015_v18 = vpop.permute.xlu1 %2014 }
 0x2d6   :  { %v2010_v11 = vpop.permute.xlu0 %2009  ;;  %v2017_v20 = vunpack.i.h.bf16 %v2015_v18  ;;  %v2016_v47 = vunpack.i.l.bf16 %v2015_v18 }
 0x2d7   :  { %v2012_v19 = vunpack.i.h.bf16 %v2010_v11  ;;  %v2011_v34 = vunpack.i.l.bf16 %v2010_v11 }
 0x2d9   :  { %v1170_v61 = vsel %vm268_vm2, %v978_v21, %v2012_v19  ;;  %v1171_v23 = vsel %vm268_vm2, %v979_v22, %v2011_v34 }
 0x2da   :  { %v2020_v24 = vpop.permute.xlu0 %2019  ;;  %v1196_v59 = vsel %vm573_vm3, %v1171_v23, %v2016_v47  ;;  %v1178_v27 = vsel %vm573_vm3, %v1170_v61, %v2017_v20 }
 0x2db   :  { %v2022_v25 = vunpack.i.h.bf16 %v2020_v24  ;;  %v2021_v26 = vunpack.i.l.bf16 %v2020_v24 }
 0x2dd   :  { %v1204_v28 = vsel %vm586_vm4, %v1196_v59, %v2021_v26  ;;  %v1186_v29 = vsel %vm586_vm4, %v1178_v27, %v2022_v25  ;;  %v2030_v30 = vpop.permute.xlu1 %2029 }
 0x2de   :  { %v2025_v31 = vpop.permute.xlu0 %2024  ;;  %1343 = vmatprep.mubr.f32.mxu0 %v1204_v28  ;;  %v2031_v58 = vunpack.i.l.bf16 %v2030_v30  ;;  %v2032_v33 = vunpack.i.h.bf16 %v2030_v30 }
 0x2df   :  { %v2027_v32 = vunpack.i.h.bf16 %v2025_v31  ;;  %1344 = vmatmul.mubr.f32.vlgmr.msra.gmra.mrb[28].mxu0 %v1186_v29  ;;  %v2026_v4 = vunpack.i.l.bf16 %v2025_v31 }
 0x2e0   :  { %v1172_v35 = vsel %vm268_vm2, %v2649_v1, %v2031_v58  ;;  %v1173_v9 = vsel %vm268_vm2, %v2657_v48, %v2032_v33 }
 0x2e1   :  { %v2035_v36 = vpop.permute.xlu1 %2034  ;;  %v1179_v37 = vsel %vm573_vm3, %v1171_v23, %v2027_v32  ;;  %v1197_v44 = vsel %vm573_vm3, %v1172_v35, %v2026_v4 }
 0x2e2   :  { %v2040_v41 = vpop.permute.xlu0 %2039  ;;  %v2037_v40 = vunpack.i.h.bf16 %v2035_v36  ;;  %v2036_v60 = vunpack.i.l.bf16 %v2035_v36  ;;  %v1187_v1 = vsel %vm586_vm4, %v1179_v37, %v2021_v26 }
 0x2e3   :  { %v2042_v3 = vunpack.i.h.bf16 %v2040_v41  ;;  %v2041_v43 = vunpack.i.l.bf16 %v2040_v41 }
 0x2e4   :  { %v1205_v54 = vsel %vm586_vm4, %v1197_v44, %v2036_v60 }
 0x2e5   :  { %v1198_v45 = vsel %vm573_vm3, %v1173_v9, %v2041_v43  ;;  %1348 = vmatprep.mubr.f32.mxu0 %v1205_v54  ;;  %v1180_v49 = vsel %vm573_vm3, %v1172_v35, %v2042_v3 }
 0x2e6   :  { %v1206_v46 = vsel %vm586_vm4, %v1198_v45, %v2037_v40  ;;  %1349 = vmatmul.mubr.f32.gmra.mrb[30].mxu0 %v1187_v1  ;;  %v1188_v53 = vsel %vm586_vm4, %v1180_v49, %v2036_v60  ;;  %v2045_v50 = vpop.permute.xlu0 %2044 }
 0x2e7   :  { %1353 = vmatprep.mubr.f32.mxu0 %v1206_v46  ;;  %v2047_v52 = vunpack.i.h.bf16 %v2045_v50  ;;  %v2046_v63 = vunpack.i.l.bf16 %v2045_v50 }
 0x2e9   :  { %v1181_v7 = vsel %vm573_vm3, %v1173_v9, %v2047_v52 }
 0x2ea   :  { %1354 = vmatmul.mubr.f32.gmra.mrb[32].mxu0 %v1188_v53  ;;  %v1189_v15 = vsel %vm586_vm4, %v1181_v7, %v2037_v40 }
 0x2f0   :  { %v2050_v51 = vpop.permute.xlu1 %2049 }
 0x2f1   :  { %v2051_v48 = vunpack.i.l.bf16 %v2050_v51  ;;  %v2052_v42 = vunpack.i.h.bf16 %v2050_v51 }
 0x2f3   :  { %v1194_v55 = vsel %vm268_vm2, %v2665_v5, %v2051_v48  ;;  %v1175_v19 = vsel %vm268_vm2, %v983_v16, %v2052_v42 }
 0x2f4   :  { %v2055_v0 = vpop.permute.xlu1 %2054  ;;  %v2065_v2 = vpop.permute.xlu0 %2064  ;;  %v1199_v12 = vsel %vm573_vm3, %v1194_v55, %v2046_v63  ;;  %v1535_v55 = vld [vmem:[%s2813_s6] ss:$0 sm:$0xff] }
 0x2f5   :  { %v2056_v6 = vunpack.i.l.bf16 %v2055_v0  ;;  %v2066_v10 = vunpack.i.l.bf16 %v2065_v2  ;;  %v2057_v18 = vunpack.i.h.bf16 %v2055_v0  ;;  %v2067_v11 = vunpack.i.h.bf16 %v2065_v2 }
 0x2f7   :  { %v1207_v57 = vsel %vm586_vm4, %v1199_v12, %v2056_v6  ;;  %v1174_v34 = vsel %vm268_vm2, %v982_v17, %v2066_v10  ;;  %v1176_v59 = vsel %vm268_vm2, %v2688_v39, %v2067_v11 }
 0x2f8   :  { %v2060_v13 = vpop.permute.xlu1 %2059  ;;  %v2070_v14 = vpop.permute.xlu0 %2069  ;;  %1358 = vmatprep.mubr.f32.mxu0 %v1207_v57 }
 0x2f9   :  { %v2062_v62 = vunpack.i.h.bf16 %v2060_v13  ;;  %v2061_v56 = vunpack.i.l.bf16 %v2060_v13  ;;  %v2071_v5 = vunpack.i.l.bf16 %v2070_v14  ;;  %1359 = vmatmul.mubr.f32.gmra.mrb[34].mxu0 %v1189_v15  ;;  %v2072_v26 = vunpack.i.h.bf16 %v2070_v14 }
 0x2fb   :  { %v1200_v20 = vsel %vm573_vm3, %v1175_v19, %v2061_v56  ;;  %v1182_v47 = vsel %vm573_vm3, %v1174_v34, %v2062_v62 }
 0x2fc   :  { %v2075_v21 = vpop.permute.xlu1 %2074  ;;  %v1049_v22 = vpop.permute.xlu0 %1048  ;;  %v1208_v61 = vsel %vm586_vm4, %v1200_v20, %v2057_v18  ;;  %v1190_v23 = vsel %vm586_vm4, %v1182_v47, %v2071_v5 }
 0x2fd   :  { %v2077_v24 = vunpack.i.h.bf16 %v2075_v21  ;;  %v2076_v25 = vunpack.i.l.bf16 %v2075_v21  ;;  %1362 = vmatprep.mubr.f32.mxu0 %v1208_v61  ;;  %v1177_v4 = vsel %vm268_vm2, %v2695_v38, %v1049_v22 }
 0x2fe   :  { %1363 = vmatmul.mubr.f32.gmra.mrb[36].mxu0 %v1190_v23 }
 0x2ff   :  { %v1201_v27 = vsel %vm573_vm3, %v1176_v59, %v2076_v25  ;;  %v1183_v28 = vsel %vm573_vm3, %v1175_v19, %v2077_v24 }
 0x300   :  { %v2080_v29 = vpop.permute.xlu1 %2079  ;;  %v1113_v30 = vpop.permute.xlu0 %1112  ;;  %v1209_v31 = vsel %vm586_vm4, %v1201_v27, %v2072_v26  ;;  %v1191_v58 = vsel %vm586_vm4, %v1183_v28, %v2057_v18 }
 0x301   :  { %v2082_v32 = vunpack.i.h.bf16 %v2080_v29  ;;  %v2081_v33 = vunpack.i.l.bf16 %v2080_v29  ;;  %1367 = vmatprep.mubr.f32.mxu0 %v1209_v31 }
 0x302   :  { %1368 = vmatmul.mubr.f32.gmra.mrb[38].mxu0 %v1191_v58 }
 0x303   :  { %v1202_v35 = vsel %vm573_vm3, %v1177_v4, %v2081_v33  ;;  %v1184_v39 = vsel %vm573_vm3, %v1176_v59, %v2082_v32 }
 0x304   :  { %v1127_v36 = vpop.permute.xlu1 %1126  ;;  %v2085_v41 = vpop.permute.xlu0 %2084  ;;  %v1210_v37 = vsel %vm586_vm4, %v1202_v35, %v1113_v30  ;;  %v1192_v40 = vsel %vm586_vm4, %v1184_v39, %v2072_v26 }
 0x305   :  { %v1195_v60 = vsel %vm268_vm2, %v2702_v8, %v1127_v36  ;;  %v2087_v3 = vunpack.i.h.bf16 %v2085_v41  ;;  %v2086_v43 = vunpack.i.l.bf16 %v2085_v41  ;;  %1372 = vmatprep.mubr.f32.mxu0 %v1210_v37 }
 0x306   :  { %1373 = vmatmul.mubr.f32.gmra.mrb[40].mxu0 %v1192_v40 }
 0x307   :  { %v1203_v38 = vsel %vm573_vm3, %v1195_v60, %v2086_v43  ;;  %v1185_v44 = vsel %vm573_vm3, %v1177_v4, %v2087_v3 }
 0x308   :  { %v1167_v9 = vpop.permute.xlu1 %1166  ;;  %v1193_v45 = vsel %vm586_vm4, %v1185_v44, %v1113_v30 }
 0x309   :  { %v1211_v54 = vsel %vm586_vm4, %v1203_v38, %v1167_v9 }
 0x30a   :  { %1377 = vmatprep.mubr.f32.mxu0 %v1211_v54 }
 0x30b   :  { %1378 = vmatmul.mubr.f32.gmra.mrb[42].mxu0 %v1193_v45 }
 0x337   :  { %v1787_v1 = vpop.f32.mrb[24].mxu1 }
 0x338   :  { %v1448_v46 = vpop.f32.mrb[25].mxu1 }
 0x33f   :  { %v1790_v49 = vpop.f32.mrb[26].mxu1 }
 0x340   :  { %v1458_v53 = vpop.f32.mrb[27].mxu1 }
 0x352   :  { %v1793_v8 = vpop.f32.mrb[28].mxu1 }
 0x353   :  { %v1467_v50 = vpop.f32.mrb[29].mxu1 }
 0x35b   :  { %v1796_v51 = vpop.f32.mrb[30].mxu1 }
 0x35c   :  { %v1477_v52 = vpop.f32.mrb[31].mxu1 }
 0x3b2   :  { %v1681_v48 = vpop.f32.mrb[28].mxu0 }
 0x3b3   :  { %v1682_v63 = vpop.f32.mrb[29].mxu0 }
 0x3b4   :  { %v1683_v0 = vadd.f32 %v1682_v63, %v1681_v48 }
 0x3b6   :  { %v1346_v2 = vadd.f32 %v1683_v0, %v1535_v55 }
 0x3b8   :  { %v1449_v6 = vadd.f32 %v1448_v46, %v1346_v2 }
 0x3b9   :  { %v1684_v7 = vpop.f32.mrb[30].mxu0 }
 0x3ba   :  { %1486 = vst.msk [vmem:[%s2814_s7] sm:$0x7] %vm1485_vm5, %v1449_v6  ;;  %v1685_v42 = vpop.f32.mrb[31].mxu0 }
 0x3bb   :  { %1489 = vst.msk [vmem:[%s2814_s7 - $0x4] sm:$0x80] %vm1488_vm6, %v1449_v6  ;;  %v1686_v10 = vadd.f32 %v1685_v42, %v1684_v7 }
 0x3bd   :  { %v1351_v12 = vadd.f32 %v1686_v10, %v1535_v55  ;;  %v1687_v57 = vpop.f32.mrb[32].mxu0 }
 0x3be   :  { %v1688_v13 = vpop.f32.mrb[33].mxu0 }
 0x3bf   :  { %v1454_v14 = vadd.f32 %v1787_v1, %v1351_v12  ;;  %v1689_v15 = vadd.f32 %v1688_v13, %v1687_v57 }
 0x3c1   :  { %1491 = vst.msk [vmem:[%s2814_s7 + $0x4] sm:$0x3] %vm1490_vm7, %v1454_v14  ;;  %v1356_v62 = vadd.f32 %v1689_v15, %v1535_v55 }
 0x3c2   :  { %1495 = vst.msk [vmem:[%s2814_s7] sm:$0xc0] %vm1494_vm8, %v1454_v14 }
 0x3c3   :  { %v1459_v56 = vadd.f32 %v1458_v53, %v1356_v62 }
 0x3c5   :  { %1497 = vst.msk [vmem:[%s2814_s7 + $0x8] sm:$0x1] %vm1496_vm9, %v1459_v56 }
 0x3cc   :  { %v1690_v5 = vpop.f32.mrb[34].mxu0 }
 0x3cd   :  { %v1691_v16 = vpop.f32.mrb[35].mxu0 }
 0x3d1   :  { %v1693_v17 = vpop.f32.mrb[36].mxu0 }
 0x3d2   :  { %v1694_v18 = vpop.f32.mrb[37].mxu0 }
 0x3d3   :  { %v1695_v11 = vadd.f32 %v1694_v18, %v1693_v17 }
 0x3d5   :  { %v1365_v19 = vadd.f32 %v1695_v11, %v1535_v55  ;;  %v1696_v34 = vpop.f32.mrb[38].mxu0 }
 0x3d6   :  { %v1697_v20 = vpop.f32.mrb[39].mxu0 }
 0x3d7   :  { %v1468_v47 = vadd.f32 %v1467_v50, %v1365_v19  ;;  %v1698_v21 = vadd.f32 %v1697_v20, %v1696_v34 }
 0x3d9   :  { %1487 = vst.msk [vmem:[%s2814_s7 + $0x10] sm:$0x7] %vm1485_vm5, %v1468_v47  ;;  %v1370_v22 = vadd.f32 %v1698_v21, %v1535_v55  ;;  %v1699_v61 = vpop.f32.mrb[40].mxu0 }
 0x3da   :  { %1492 = vst.msk [vmem:[%s2814_s7 + $0xc] sm:$0x80] %vm1488_vm6, %v1468_v47  ;;  %v1700_v23 = vpop.f32.mrb[41].mxu0 }
 0x3db   :  { %v1473_v24 = vadd.f32 %v1793_v8, %v1370_v22  ;;  %v1701_v25 = vadd.f32 %v1700_v23, %v1699_v61 }
 0x3dd   :  { %1493 = vst.msk [vmem:[%s2814_s7 + $0x14] sm:$0x3] %vm1490_vm7, %v1473_v24  ;;  %v1375_v26 = vadd.f32 %v1701_v25, %v1535_v55 }
 0x3de   :  { %1498 = vst.msk [vmem:[%s2814_s7 + $0x10] sm:$0xc0] %vm1494_vm8, %v1473_v24  ;;  %v1702_v59 = vpop.f32.mrb[42].mxu0 }
 0x3df   :  { %v1478_v27 = vadd.f32 %v1477_v52, %v1375_v26  ;;  %v1703_v28 = vpop.f32.mrb[43].mxu0 }
 0x3e1   :  { %1499 = vst.msk [vmem:[%s2814_s7 + $0x18] sm:$0x1] %vm1496_vm9, %v1478_v27 }

</bundles_post_ra>
